<compile_context>
chip_gen: v5e
topology: v5e:2x2
jax: 0.10.0
libtpu: 0.0.40
codegen_flags: <defaults>
</compile_context>

<pallas_src>
import jax
import jax.numpy as jnp
from jax.experimental import pallas as pl
from jax.experimental.pallas import tpu as pltpu

KH = KW = 8
STRIDE = 4
C_OUT = 96
C_PAD = 128          # lane-padded channel width
N_CLS = 7
OH = OW = 11         # (48 - 8) // 4 + 1
PH = PW = 5          # (11 - 3) // 2 + 1
K_IM2COL = KH * KW   # 64 (Cin = 1)
K_FC = PH * PW * C_PAD  # 3200


# ---------------------------------------------------------------------------
# Fused kernel: conv(GEMM) -> 3x3/s2 maxpool -> (+bias, ReLU) -> FC(+bias,ReLU)
# ---------------------------------------------------------------------------
def _make_fused_kernel(TB):
    def kernel(p_ref, cw_ref, cb25_ref, fw_ref, fb_ref, o_ref):
        # --- conv as im2col GEMM (bf16 MXU inputs, f32 accumulate).
        # Rows are ordered (oh, ow, b_in_tile): row (oh*11+ow)*TB + b.
        conv = jnp.dot(p_ref[0], cw_ref[...],
                       preferred_element_type=jnp.float32)      # [121*TB, 128]

        # --- 3x3/s2 max-pool: only the 25 needed pooled positions, each a
        #     9-way max over contiguous, sublane-aligned [TB,128] row-blocks.
        blocks = []
        for ph in range(PH):
            for pw in range(PW):
                m = None
                for dh in range(3):
                    for dw in range(3):
                        r = ((2 * ph + dh) * OW + (2 * pw + dw)) * TB
                        blk = conv[r:r + TB]                     # [TB, 128]
                        m = blk if m is None else jnp.maximum(m, blk)
                blocks.append(m)

        # --- conv bias + ReLU applied post-pool (valid: max/ReLU commute with
        #     a per-channel bias add), on the lane-dense [TB, 25*128] FC LHS.
        lhs = jnp.maximum(jnp.concatenate(blocks, axis=1) + cb25_ref[...], 0.0)

        # --- FC (+bias, ReLU) as a single K=3200 MXU stream.
        acc = jnp.dot(lhs.astype(jnp.bfloat16), fw_ref[...],
                      preferred_element_type=jnp.float32)        # [TB, 128]
        o_ref[...] = jnp.maximum(acc + fb_ref[...], 0.0)

    return kernel


# ---------------------------------------------------------------------------
# One-time parameter prep (pad / permute / cast into kernel-friendly layouts)
# ---------------------------------------------------------------------------
def prepare_params(params):
    conv_w, conv_b = params["conv_w"], params["conv_b"]   # [96,1,8,8], [96]
    fc_w, fc_b = params["fc_w"], params["fc_b"]           # [7,2400], [7]

    cw = conv_w.reshape(C_OUT, K_IM2COL).T                # [64, 96]  (k = kh*8+kw)
    cw = jnp.pad(cw, ((0, 0), (0, C_PAD - C_OUT))).astype(jnp.bfloat16)  # [64,128]

    cb = jnp.pad(conv_b, (0, C_PAD - C_OUT)).reshape(1, C_PAD)
    cb25 = jnp.tile(cb, (1, PH * PW)).astype(jnp.float32)  # [1, 3200]

    # fc_w columns are in PyTorch (c, h, w) order; regroup to [(h,w), c, n]
    # so the channel-on-lanes pooled LHS (pos-major, channel-minor columns)
    # feeds the FC with NO activation transpose.
    w = fc_w.reshape(N_CLS, C_OUT, PH, PW)                 # [n, c, h, w]
    w = jnp.transpose(w, (2, 3, 1, 0)).reshape(PH * PW, C_OUT, N_CLS)
    w = jnp.pad(w, ((0, 0), (0, C_PAD - C_OUT), (0, C_PAD - N_CLS)))
    fw = w.reshape(K_FC, C_PAD).astype(jnp.bfloat16)       # [3200, 128]

    fb = jnp.pad(fc_b, (0, C_PAD - N_CLS)).reshape(1, C_PAD).astype(jnp.float32)
    return cw, cb25, fw, fb


def _choose_tile(B):
    """Batch padded to a multiple of 8; per-step tile TB in {8,16,32,64}."""
    b_pad = ((B + 7) // 8) * 8
    for tb in (64, 32, 16, 8):
        if b_pad % tb == 0:
            return b_pad, tb
    return b_pad, 8


# ---------------------------------------------------------------------------
# Forward pass
# ---------------------------------------------------------------------------
def net_forward(x, prepped):
    """x: [B, 1, 48, 48] float32 (NCHW). Returns [B, 7]."""
    cw, cb25, fw, fb = prepped
    B = x.shape[0]
    B_pad, TB = _choose_tile(B)
    G = B_pad // TB

    # im2col as a single XLA op (Cin=1, so NCHW->NHWC is a pure reshape).
    patches = jax.lax.conv_general_dilated_patches(
        x.reshape(B, 48, 48, 1), filter_shape=(KH, KW),
        window_strides=(STRIDE, STRIDE), padding="VALID",
        dimension_numbers=("NHWC", "HWIO", "NHWC"))        # [B, 11, 11, 64]
    patches = patches.reshape(B, OH * OW, K_IM2COL)
    if B_pad != B:
        patches = jnp.pad(patches, ((0, B_pad - B), (0, 0), (0, 0)))
    # Chunk-major (oh, ow, b_in_chunk) row order: one reordering op feeding
    # the pipelined per-chunk DMA; every pooled window's contributing rows
    # become contiguous [TB,128] blocks inside the kernel.
    patches = (patches.reshape(G, TB, OH * OW, K_IM2COL)
                      .transpose(0, 2, 1, 3)
                      .reshape(G, OH * OW * TB, K_IM2COL)
                      .astype(jnp.bfloat16))               # [G, 121*TB, 64]

    flops = (2 * OH * OW * B_pad * K_IM2COL * C_PAD        # conv GEMM
             + 2 * B_pad * K_FC * C_PAD)                   # FC GEMM
    bytes_accessed = (patches.size * 2 + cw.size * 2 + cb25.size * 4
                      + fw.size * 2 + fb.size * 4 + B_pad * C_PAD * 4)

    out = pl.pallas_call(
        _make_fused_kernel(TB),
        out_shape=jax.ShapeDtypeStruct((B_pad, C_PAD), jnp.float32),
        grid=(G,),
        in_specs=[
            pl.BlockSpec((1, OH * OW * TB, K_IM2COL), lambda i: (i, 0, 0)),
            pl.BlockSpec((K_IM2COL, C_PAD), lambda i: (0, 0)),
            pl.BlockSpec((1, K_FC), lambda i: (0, 0)),
            pl.BlockSpec((K_FC, C_PAD), lambda i: (0, 0)),
            pl.BlockSpec((1, C_PAD), lambda i: (0, 0)),
        ],
        out_specs=pl.BlockSpec((TB, C_PAD), lambda i: (i, 0)),
        compiler_params=pltpu.CompilerParams(
            dimension_semantics=("parallel",),
            vmem_limit_bytes=32 * 1024 * 1024),
        cost_estimate=pl.CostEstimate(
            flops=flops, transcendentals=0, bytes_accessed=bytes_accessed),
    )(patches, cw, cb25, fw, fb)
    return out[:B, :N_CLS]


# Pure-JAX reference for a sanity check
def net_forward_ref(x, params):
    conv_w, conv_b = params["conv_w"], params["conv_b"]
    fc_w, fc_b = params["fc_w"], params["fc_b"]
    y = jax.lax.conv_general_dilated(
        x, conv_w, window_strides=(STRIDE, STRIDE), padding="VALID",
        dimension_numbers=("NCHW", "OIHW", "NCHW"))
    y = jnp.maximum(y + conv_b[None, :, None, None], 0.0)
    y = jax.lax.reduce_window(
        y, -jnp.inf, jax.lax.max,
        window_dimensions=(1, 1, 3, 3), window_strides=(1, 1, 2, 2),
        padding="VALID")
    y = y.reshape(y.shape[0], -1)
    return jnp.maximum(y @ fc_w.T + fc_b[None, :], 0.0)


if __name__ == "__main__":
    key = jax.random.PRNGKey(0)
    k_x, k_cw, k_cb, k_fw, k_fb = jax.random.split(key, 5)

    B = 2
    x = jax.random.normal(k_x, (B, 1, 48, 48), dtype=jnp.float32)
    params = {
        "conv_w": jax.random.normal(k_cw, (C_OUT, 1, KH, KW), jnp.float32) * 0.05,
        "conv_b": jax.random.normal(k_cb, (C_OUT,), jnp.float32) * 0.05,
        "fc_w": jax.random.normal(k_fw, (N_CLS, C_OUT * PH * PW), jnp.float32) * 0.02,
        "fc_b": jax.random.normal(k_fb, (N_CLS,), jnp.float32) * 0.02,
    }

    prepped = prepare_params(params)          # one-time weight prep
    fwd = jax.jit(net_forward)

    out = jax.block_until_ready(fwd(x, prepped))
    assert out.shape == (B, N_CLS), out.shape

    ref = jax.block_until_ready(net_forward_ref(x, params))
    assert jnp.allclose(out, ref, rtol=1e-2, atol=1e-2), (out, ref)

    print("KERNEL_OK")
</pallas_src>

<mosaic_0001>
module attributes {stable_mosaic.version = 11 : i64} {
  func.func @kernel(%arg0: i32, %arg1: memref<1x968x64xbf16, #tpu.memory_space<vmem>>, %arg2: memref<64x128xbf16, #tpu.memory_space<vmem>>, %arg3: memref<1x3200xf32, #tpu.memory_space<vmem>>, %arg4: memref<3200x128xbf16, #tpu.memory_space<vmem>>, %arg5: memref<1x128xf32, #tpu.memory_space<vmem>>, %arg6: memref<8x128xf32, #tpu.memory_space<vmem>>) attributes {dimension_semantics = [#tpu.dimension_semantics<parallel>], iteration_bounds = array<i64: 1>, scalar_prefetch = 0 : i64, scratch_operands = 0 : i64, tpu.core_type = #tpu.core_type<tc>, window_params = [{transform_indices = @transform_0, window_bounds = array<i64: 1, 968, 64>}, {pipeline_mode = #tpu.pipeline_mode<synchronous>, transform_indices = @transform_1, window_bounds = array<i64: 64, 128>}, {pipeline_mode = #tpu.pipeline_mode<synchronous>, transform_indices = @transform_2, window_bounds = array<i64: 1, 3200>}, {pipeline_mode = #tpu.pipeline_mode<synchronous>, transform_indices = @transform_3, window_bounds = array<i64: 3200, 128>}, {pipeline_mode = #tpu.pipeline_mode<synchronous>, transform_indices = @transform_4, window_bounds = array<i64: 1, 128>}, {transform_indices = @transform_5, window_bounds = array<i64: 8, 128>}]} {
    %c0 = arith.constant 0 : index
    %c0_0 = arith.constant 0 : index
    %c0_1 = arith.constant 0 : index
    %0 = vector.load %arg1[%c0, %c0_0, %c0_1] : memref<1x968x64xbf16, #tpu.memory_space<vmem>>, vector<1x968x64xbf16>
    %1 = vector.shape_cast %0 : vector<1x968x64xbf16> to vector<968x64xbf16>
    %c0_2 = arith.constant 0 : index
    %c0_3 = arith.constant 0 : index
    %2 = vector.load %arg2[%c0_2, %c0_3] : memref<64x128xbf16, #tpu.memory_space<vmem>>, vector<64x128xbf16>
    %cst = arith.constant dense<0.000000e+00> : vector<968x128xf32>
    %3 = tpu.matmul %1, %2, %cst {dimension_numbers = #tpu.dot_dimension_numbers<[1], [0], [0], [1], [0, 0, 1, 1], [], []>} : vector<968x64xbf16>, vector<64x128xbf16>, vector<968x128xf32> -> vector<968x128xf32>
    %4 = vector.extract_strided_slice %3 {offsets = [0, 0], sizes = [8, 128], strides = [1, 1]} : vector<968x128xf32> to vector<8x128xf32>
    %5 = vector.extract_strided_slice %3 {offsets = [8, 0], sizes = [8, 128], strides = [1, 1]} : vector<968x128xf32> to vector<8x128xf32>
    %6 = arith.maximumf %4, %5 : vector<8x128xf32>
    %7 = vector.extract_strided_slice %3 {offsets = [16, 0], sizes = [8, 128], strides = [1, 1]} : vector<968x128xf32> to vector<8x128xf32>
    %8 = arith.maximumf %6, %7 : vector<8x128xf32>
    %9 = vector.extract_strided_slice %3 {offsets = [88, 0], sizes = [8, 128], strides = [1, 1]} : vector<968x128xf32> to vector<8x128xf32>
    %10 = arith.maximumf %8, %9 : vector<8x128xf32>
    %11 = vector.extract_strided_slice %3 {offsets = [96, 0], sizes = [8, 128], strides = [1, 1]} : vector<968x128xf32> to vector<8x128xf32>
    %12 = arith.maximumf %10, %11 : vector<8x128xf32>
    %13 = vector.extract_strided_slice %3 {offsets = [104, 0], sizes = [8, 128], strides = [1, 1]} : vector<968x128xf32> to vector<8x128xf32>
    %14 = arith.maximumf %12, %13 : vector<8x128xf32>
    %15 = vector.extract_strided_slice %3 {offsets = [176, 0], sizes = [8, 128], strides = [1, 1]} : vector<968x128xf32> to vector<8x128xf32>
    %16 = arith.maximumf %14, %15 : vector<8x128xf32>
    %17 = vector.extract_strided_slice %3 {offsets = [184, 0], sizes = [8, 128], strides = [1, 1]} : vector<968x128xf32> to vector<8x128xf32>
    %18 = arith.maximumf %16, %17 : vector<8x128xf32>
    %19 = vector.extract_strided_slice %3 {offsets = [192, 0], sizes = [8, 128], strides = [1, 1]} : vector<968x128xf32> to vector<8x128xf32>
    %20 = arith.maximumf %18, %19 : vector<8x128xf32>
    %21 = vector.extract_strided_slice %3 {offsets = [16, 0], sizes = [8, 128], strides = [1, 1]} : vector<968x128xf32> to vector<8x128xf32>
    %22 = vector.extract_strided_slice %3 {offsets = [24, 0], sizes = [8, 128], strides = [1, 1]} : vector<968x128xf32> to vector<8x128xf32>
    %23 = arith.maximumf %21, %22 : vector<8x128xf32>
    %24 = vector.extract_strided_slice %3 {offsets = [32, 0], sizes = [8, 128], strides = [1, 1]} : vector<968x128xf32> to vector<8x128xf32>
    %25 = arith.maximumf %23, %24 : vector<8x128xf32>
    %26 = vector.extract_strided_slice %3 {offsets = [104, 0], sizes = [8, 128], strides = [1, 1]} : vector<968x128xf32> to vector<8x128xf32>
    %27 = arith.maximumf %25, %26 : vector<8x128xf32>
    %28 = vector.extract_strided_slice %3 {offsets = [112, 0], sizes = [8, 128], strides = [1, 1]} : vector<968x128xf32> to vector<8x128xf32>
    %29 = arith.maximumf %27, %28 : vector<8x128xf32>
    %30 = vector.extract_strided_slice %3 {offsets = [120, 0], sizes = [8, 128], strides = [1, 1]} : vector<968x128xf32> to vector<8x128xf32>
    %31 = arith.maximumf %29, %30 : vector<8x128xf32>
    %32 = vector.extract_strided_slice %3 {offsets = [192, 0], sizes = [8, 128], strides = [1, 1]} : vector<968x128xf32> to vector<8x128xf32>
    %33 = arith.maximumf %31, %32 : vector<8x128xf32>
    %34 = vector.extract_strided_slice %3 {offsets = [200, 0], sizes = [8, 128], strides = [1, 1]} : vector<968x128xf32> to vector<8x128xf32>
    %35 = arith.maximumf %33, %34 : vector<8x128xf32>
    %36 = vector.extract_strided_slice %3 {offsets = [208, 0], sizes = [8, 128], strides = [1, 1]} : vector<968x128xf32> to vector<8x128xf32>
    %37 = arith.maximumf %35, %36 : vector<8x128xf32>
    %38 = vector.extract_strided_slice %3 {offsets = [32, 0], sizes = [8, 128], strides = [1, 1]} : vector<968x128xf32> to vector<8x128xf32>
    %39 = vector.extract_strided_slice %3 {offsets = [40, 0], sizes = [8, 128], strides = [1, 1]} : vector<968x128xf32> to vector<8x128xf32>
    %40 = arith.maximumf %38, %39 : vector<8x128xf32>
    %41 = vector.extract_strided_slice %3 {offsets = [48, 0], sizes = [8, 128], strides = [1, 1]} : vector<968x128xf32> to vector<8x128xf32>
    %42 = arith.maximumf %40, %41 : vector<8x128xf32>
    %43 = vector.extract_strided_slice %3 {offsets = [120, 0], sizes = [8, 128], strides = [1, 1]} : vector<968x128xf32> to vector<8x128xf32>
    %44 = arith.maximumf %42, %43 : vector<8x128xf32>
    %45 = vector.extract_strided_slice %3 {offsets = [128, 0], sizes = [8, 128], strides = [1, 1]} : vector<968x128xf32> to vector<8x128xf32>
    %46 = arith.maximumf %44, %45 : vector<8x128xf32>
    %47 = vector.extract_strided_slice %3 {offsets = [136, 0], sizes = [8, 128], strides = [1, 1]} : vector<968x128xf32> to vector<8x128xf32>
    %48 = arith.maximumf %46, %47 : vector<8x128xf32>
    %49 = vector.extract_strided_slice %3 {offsets = [208, 0], sizes = [8, 128], strides = [1, 1]} : vector<968x128xf32> to vector<8x128xf32>
    %50 = arith.maximumf %48, %49 : vector<8x128xf32>
    %51 = vector.extract_strided_slice %3 {offsets = [216, 0], sizes = [8, 128], strides = [1, 1]} : vector<968x128xf32> to vector<8x128xf32>
    %52 = arith.maximumf %50, %51 : vector<8x128xf32>
    %53 = vector.extract_strided_slice %3 {offsets = [224, 0], sizes = [8, 128], strides = [1, 1]} : vector<968x128xf32> to vector<8x128xf32>
    %54 = arith.maximumf %52, %53 : vector<8x128xf32>
    %55 = vector.extract_strided_slice %3 {offsets = [48, 0], sizes = [8, 128], strides = [1, 1]} : vector<968x128xf32> to vector<8x128xf32>
    %56 = vector.extract_strided_slice %3 {offsets = [56, 0], sizes = [8, 128], strides = [1, 1]} : vector<968x128xf32> to vector<8x128xf32>
    %57 = arith.maximumf %55, %56 : vector<8x128xf32>
    %58 = vector.extract_strided_slice %3 {offsets = [64, 0], sizes = [8, 128], strides = [1, 1]} : vector<968x128xf32> to vector<8x128xf32>
    %59 = arith.maximumf %57, %58 : vector<8x128xf32>
    %60 = vector.extract_strided_slice %3 {offsets = [136, 0], sizes = [8, 128], strides = [1, 1]} : vector<968x128xf32> to vector<8x128xf32>
    %61 = arith.maximumf %59, %60 : vector<8x128xf32>
    %62 = vector.extract_strided_slice %3 {offsets = [144, 0], sizes = [8, 128], strides = [1, 1]} : vector<968x128xf32> to vector<8x128xf32>
    %63 = arith.maximumf %61, %62 : vector<8x128xf32>
    %64 = vector.extract_strided_slice %3 {offsets = [152, 0], sizes = [8, 128], strides = [1, 1]} : vector<968x128xf32> to vector<8x128xf32>
    %65 = arith.maximumf %63, %64 : vector<8x128xf32>
    %66 = vector.extract_strided_slice %3 {offsets = [224, 0], sizes = [8, 128], strides = [1, 1]} : vector<968x128xf32> to vector<8x128xf32>
    %67 = arith.maximumf %65, %66 : vector<8x128xf32>
    %68 = vector.extract_strided_slice %3 {offsets = [232, 0], sizes = [8, 128], strides = [1, 1]} : vector<968x128xf32> to vector<8x128xf32>
    %69 = arith.maximumf %67, %68 : vector<8x128xf32>
    %70 = vector.extract_strided_slice %3 {offsets = [240, 0], sizes = [8, 128], strides = [1, 1]} : vector<968x128xf32> to vector<8x128xf32>
    %71 = arith.maximumf %69, %70 : vector<8x128xf32>
    %72 = vector.extract_strided_slice %3 {offsets = [64, 0], sizes = [8, 128], strides = [1, 1]} : vector<968x128xf32> to vector<8x128xf32>
    %73 = vector.extract_strided_slice %3 {offsets = [72, 0], sizes = [8, 128], strides = [1, 1]} : vector<968x128xf32> to vector<8x128xf32>
    %74 = arith.maximumf %72, %73 : vector<8x128xf32>
    %75 = vector.extract_strided_slice %3 {offsets = [80, 0], sizes = [8, 128], strides = [1, 1]} : vector<968x128xf32> to vector<8x128xf32>
    %76 = arith.maximumf %74, %75 : vector<8x128xf32>
    %77 = vector.extract_strided_slice %3 {offsets = [152, 0], sizes = [8, 128], strides = [1, 1]} : vector<968x128xf32> to vector<8x128xf32>
    %78 = arith.maximumf %76, %77 : vector<8x128xf32>
    %79 = vector.extract_strided_slice %3 {offsets = [160, 0], sizes = [8, 128], strides = [1, 1]} : vector<968x128xf32> to vector<8x128xf32>
    %80 = arith.maximumf %78, %79 : vector<8x128xf32>
    %81 = vector.extract_strided_slice %3 {offsets = [168, 0], sizes = [8, 128], strides = [1, 1]} : vector<968x128xf32> to vector<8x128xf32>
    %82 = arith.maximumf %80, %81 : vector<8x128xf32>
    %83 = vector.extract_strided_slice %3 {offsets = [240, 0], sizes = [8, 128], strides = [1, 1]} : vector<968x128xf32> to vector<8x128xf32>
    %84 = arith.maximumf %82, %83 : vector<8x128xf32>
    %85 = vector.extract_strided_slice %3 {offsets = [248, 0], sizes = [8, 128], strides = [1, 1]} : vector<968x128xf32> to vector<8x128xf32>
    %86 = arith.maximumf %84, %85 : vector<8x128xf32>
    %87 = vector.extract_strided_slice %3 {offsets = [256, 0], sizes = [8, 128], strides = [1, 1]} : vector<968x128xf32> to vector<8x128xf32>
    %88 = arith.maximumf %86, %87 : vector<8x128xf32>
    %89 = vector.extract_strided_slice %3 {offsets = [176, 0], sizes = [8, 128], strides = [1, 1]} : vector<968x128xf32> to vector<8x128xf32>
    %90 = vector.extract_strided_slice %3 {offsets = [184, 0], sizes = [8, 128], strides = [1, 1]} : vector<968x128xf32> to vector<8x128xf32>
    %91 = arith.maximumf %89, %90 : vector<8x128xf32>
    %92 = vector.extract_strided_slice %3 {offsets = [192, 0], sizes = [8, 128], strides = [1, 1]} : vector<968x128xf32> to vector<8x128xf32>
    %93 = arith.maximumf %91, %92 : vector<8x128xf32>
    %94 = vector.extract_strided_slice %3 {offsets = [264, 0], sizes = [8, 128], strides = [1, 1]} : vector<968x128xf32> to vector<8x128xf32>
    %95 = arith.maximumf %93, %94 : vector<8x128xf32>
    %96 = vector.extract_strided_slice %3 {offsets = [272, 0], sizes = [8, 128], strides = [1, 1]} : vector<968x128xf32> to vector<8x128xf32>
    %97 = arith.maximumf %95, %96 : vector<8x128xf32>
    %98 = vector.extract_strided_slice %3 {offsets = [280, 0], sizes = [8, 128], strides = [1, 1]} : vector<968x128xf32> to vector<8x128xf32>
    %99 = arith.maximumf %97, %98 : vector<8x128xf32>
    %100 = vector.extract_strided_slice %3 {offsets = [352, 0], sizes = [8, 128], strides = [1, 1]} : vector<968x128xf32> to vector<8x128xf32>
    %101 = arith.maximumf %99, %100 : vector<8x128xf32>
    %102 = vector.extract_strided_slice %3 {offsets = [360, 0], sizes = [8, 128], strides = [1, 1]} : vector<968x128xf32> to vector<8x128xf32>
    %103 = arith.maximumf %101, %102 : vector<8x128xf32>
    %104 = vector.extract_strided_slice %3 {offsets = [368, 0], sizes = [8, 128], strides = [1, 1]} : vector<968x128xf32> to vector<8x128xf32>
    %105 = arith.maximumf %103, %104 : vector<8x128xf32>
    %106 = vector.extract_strided_slice %3 {offsets = [192, 0], sizes = [8, 128], strides = [1, 1]} : vector<968x128xf32> to vector<8x128xf32>
    %107 = vector.extract_strided_slice %3 {offsets = [200, 0], sizes = [8, 128], strides = [1, 1]} : vector<968x128xf32> to vector<8x128xf32>
    %108 = arith.maximumf %106, %107 : vector<8x128xf32>
    %109 = vector.extract_strided_slice %3 {offsets = [208, 0], sizes = [8, 128], strides = [1, 1]} : vector<968x128xf32> to vector<8x128xf32>
    %110 = arith.maximumf %108, %109 : vector<8x128xf32>
    %111 = vector.extract_strided_slice %3 {offsets = [280, 0], sizes = [8, 128], strides = [1, 1]} : vector<968x128xf32> to vector<8x128xf32>
    %112 = arith.maximumf %110, %111 : vector<8x128xf32>
    %113 = vector.extract_strided_slice %3 {offsets = [288, 0], sizes = [8, 128], strides = [1, 1]} : vector<968x128xf32> to vector<8x128xf32>
    %114 = arith.maximumf %112, %113 : vector<8x128xf32>
    %115 = vector.extract_strided_slice %3 {offsets = [296, 0], sizes = [8, 128], strides = [1, 1]} : vector<968x128xf32> to vector<8x128xf32>
    %116 = arith.maximumf %114, %115 : vector<8x128xf32>
    %117 = vector.extract_strided_slice %3 {offsets = [368, 0], sizes = [8, 128], strides = [1, 1]} : vector<968x128xf32> to vector<8x128xf32>
    %118 = arith.maximumf %116, %117 : vector<8x128xf32>
    %119 = vector.extract_strided_slice %3 {offsets = [376, 0], sizes = [8, 128], strides = [1, 1]} : vector<968x128xf32> to vector<8x128xf32>
    %120 = arith.maximumf %118, %119 : vector<8x128xf32>
    %121 = vector.extract_strided_slice %3 {offsets = [384, 0], sizes = [8, 128], strides = [1, 1]} : vector<968x128xf32> to vector<8x128xf32>
    %122 = arith.maximumf %120, %121 : vector<8x128xf32>
    %123 = vector.extract_strided_slice %3 {offsets = [208, 0], sizes = [8, 128], strides = [1, 1]} : vector<968x128xf32> to vector<8x128xf32>
    %124 = vector.extract_strided_slice %3 {offsets = [216, 0], sizes = [8, 128], strides = [1, 1]} : vector<968x128xf32> to vector<8x128xf32>
    %125 = arith.maximumf %123, %124 : vector<8x128xf32>
    %126 = vector.extract_strided_slice %3 {offsets = [224, 0], sizes = [8, 128], strides = [1, 1]} : vector<968x128xf32> to vector<8x128xf32>
    %127 = arith.maximumf %125, %126 : vector<8x128xf32>
    %128 = vector.extract_strided_slice %3 {offsets = [296, 0], sizes = [8, 128], strides = [1, 1]} : vector<968x128xf32> to vector<8x128xf32>
    %129 = arith.maximumf %127, %128 : vector<8x128xf32>
    %130 = vector.extract_strided_slice %3 {offsets = [304, 0], sizes = [8, 128], strides = [1, 1]} : vector<968x128xf32> to vector<8x128xf32>
    %131 = arith.maximumf %129, %130 : vector<8x128xf32>
    %132 = vector.extract_strided_slice %3 {offsets = [312, 0], sizes = [8, 128], strides = [1, 1]} : vector<968x128xf32> to vector<8x128xf32>
    %133 = arith.maximumf %131, %132 : vector<8x128xf32>
    %134 = vector.extract_strided_slice %3 {offsets = [384, 0], sizes = [8, 128], strides = [1, 1]} : vector<968x128xf32> to vector<8x128xf32>
    %135 = arith.maximumf %133, %134 : vector<8x128xf32>
    %136 = vector.extract_strided_slice %3 {offsets = [392, 0], sizes = [8, 128], strides = [1, 1]} : vector<968x128xf32> to vector<8x128xf32>
    %137 = arith.maximumf %135, %136 : vector<8x128xf32>
    %138 = vector.extract_strided_slice %3 {offsets = [400, 0], sizes = [8, 128], strides = [1, 1]} : vector<968x128xf32> to vector<8x128xf32>
    %139 = arith.maximumf %137, %138 : vector<8x128xf32>
    %140 = vector.extract_strided_slice %3 {offsets = [224, 0], sizes = [8, 128], strides = [1, 1]} : vector<968x128xf32> to vector<8x128xf32>
    %141 = vector.extract_strided_slice %3 {offsets = [232, 0], sizes = [8, 128], strides = [1, 1]} : vector<968x128xf32> to vector<8x128xf32>
    %142 = arith.maximumf %140, %141 : vector<8x128xf32>
    %143 = vector.extract_strided_slice %3 {offsets = [240, 0], sizes = [8, 128], strides = [1, 1]} : vector<968x128xf32> to vector<8x128xf32>
    %144 = arith.maximumf %142, %143 : vector<8x128xf32>
    %145 = vector.extract_strided_slice %3 {offsets = [312, 0], sizes = [8, 128], strides = [1, 1]} : vector<968x128xf32> to vector<8x128xf32>
    %146 = arith.maximumf %144, %145 : vector<8x128xf32>
    %147 = vector.extract_strided_slice %3 {offsets = [320, 0], sizes = [8, 128], strides = [1, 1]} : vector<968x128xf32> to vector<8x128xf32>
    %148 = arith.maximumf %146, %147 : vector<8x128xf32>
    %149 = vector.extract_strided_slice %3 {offsets = [328, 0], sizes = [8, 128], strides = [1, 1]} : vector<968x128xf32> to vector<8x128xf32>
    %150 = arith.maximumf %148, %149 : vector<8x128xf32>
    %151 = vector.extract_strided_slice %3 {offsets = [400, 0], sizes = [8, 128], strides = [1, 1]} : vector<968x128xf32> to vector<8x128xf32>
    %152 = arith.maximumf %150, %151 : vector<8x128xf32>
    %153 = vector.extract_strided_slice %3 {offsets = [408, 0], sizes = [8, 128], strides = [1, 1]} : vector<968x128xf32> to vector<8x128xf32>
    %154 = arith.maximumf %152, %153 : vector<8x128xf32>
    %155 = vector.extract_strided_slice %3 {offsets = [416, 0], sizes = [8, 128], strides = [1, 1]} : vector<968x128xf32> to vector<8x128xf32>
    %156 = arith.maximumf %154, %155 : vector<8x128xf32>
    %157 = vector.extract_strided_slice %3 {offsets = [240, 0], sizes = [8, 128], strides = [1, 1]} : vector<968x128xf32> to vector<8x128xf32>
    %158 = vector.extract_strided_slice %3 {offsets = [248, 0], sizes = [8, 128], strides = [1, 1]} : vector<968x128xf32> to vector<8x128xf32>
    %159 = arith.maximumf %157, %158 : vector<8x128xf32>
    %160 = vector.extract_strided_slice %3 {offsets = [256, 0], sizes = [8, 128], strides = [1, 1]} : vector<968x128xf32> to vector<8x128xf32>
    %161 = arith.maximumf %159, %160 : vector<8x128xf32>
    %162 = vector.extract_strided_slice %3 {offsets = [328, 0], sizes = [8, 128], strides = [1, 1]} : vector<968x128xf32> to vector<8x128xf32>
    %163 = arith.maximumf %161, %162 : vector<8x128xf32>
    %164 = vector.extract_strided_slice %3 {offsets = [336, 0], sizes = [8, 128], strides = [1, 1]} : vector<968x128xf32> to vector<8x128xf32>
    %165 = arith.maximumf %163, %164 : vector<8x128xf32>
    %166 = vector.extract_strided_slice %3 {offsets = [344, 0], sizes = [8, 128], strides = [1, 1]} : vector<968x128xf32> to vector<8x128xf32>
    %167 = arith.maximumf %165, %166 : vector<8x128xf32>
    %168 = vector.extract_strided_slice %3 {offsets = [416, 0], sizes = [8, 128], strides = [1, 1]} : vector<968x128xf32> to vector<8x128xf32>
    %169 = arith.maximumf %167, %168 : vector<8x128xf32>
    %170 = vector.extract_strided_slice %3 {offsets = [424, 0], sizes = [8, 128], strides = [1, 1]} : vector<968x128xf32> to vector<8x128xf32>
    %171 = arith.maximumf %169, %170 : vector<8x128xf32>
    %172 = vector.extract_strided_slice %3 {offsets = [432, 0], sizes = [8, 128], strides = [1, 1]} : vector<968x128xf32> to vector<8x128xf32>
    %173 = arith.maximumf %171, %172 : vector<8x128xf32>
    %174 = vector.extract_strided_slice %3 {offsets = [352, 0], sizes = [8, 128], strides = [1, 1]} : vector<968x128xf32> to vector<8x128xf32>
    %175 = vector.extract_strided_slice %3 {offsets = [360, 0], sizes = [8, 128], strides = [1, 1]} : vector<968x128xf32> to vector<8x128xf32>
    %176 = arith.maximumf %174, %175 : vector<8x128xf32>
    %177 = vector.extract_strided_slice %3 {offsets = [368, 0], sizes = [8, 128], strides = [1, 1]} : vector<968x128xf32> to vector<8x128xf32>
    %178 = arith.maximumf %176, %177 : vector<8x128xf32>
    %179 = vector.extract_strided_slice %3 {offsets = [440, 0], sizes = [8, 128], strides = [1, 1]} : vector<968x128xf32> to vector<8x128xf32>
    %180 = arith.maximumf %178, %179 : vector<8x128xf32>
    %181 = vector.extract_strided_slice %3 {offsets = [448, 0], sizes = [8, 128], strides = [1, 1]} : vector<968x128xf32> to vector<8x128xf32>
    %182 = arith.maximumf %180, %181 : vector<8x128xf32>
    %183 = vector.extract_strided_slice %3 {offsets = [456, 0], sizes = [8, 128], strides = [1, 1]} : vector<968x128xf32> to vector<8x128xf32>
    %184 = arith.maximumf %182, %183 : vector<8x128xf32>
    %185 = vector.extract_strided_slice %3 {offsets = [528, 0], sizes = [8, 128], strides = [1, 1]} : vector<968x128xf32> to vector<8x128xf32>
    %186 = arith.maximumf %184, %185 : vector<8x128xf32>
    %187 = vector.extract_strided_slice %3 {offsets = [536, 0], sizes = [8, 128], strides = [1, 1]} : vector<968x128xf32> to vector<8x128xf32>
    %188 = arith.maximumf %186, %187 : vector<8x128xf32>
    %189 = vector.extract_strided_slice %3 {offsets = [544, 0], sizes = [8, 128], strides = [1, 1]} : vector<968x128xf32> to vector<8x128xf32>
    %190 = arith.maximumf %188, %189 : vector<8x128xf32>
    %191 = vector.extract_strided_slice %3 {offsets = [368, 0], sizes = [8, 128], strides = [1, 1]} : vector<968x128xf32> to vector<8x128xf32>
    %192 = vector.extract_strided_slice %3 {offsets = [376, 0], sizes = [8, 128], strides = [1, 1]} : vector<968x128xf32> to vector<8x128xf32>
    %193 = arith.maximumf %191, %192 : vector<8x128xf32>
    %194 = vector.extract_strided_slice %3 {offsets = [384, 0], sizes = [8, 128], strides = [1, 1]} : vector<968x128xf32> to vector<8x128xf32>
    %195 = arith.maximumf %193, %194 : vector<8x128xf32>
    %196 = vector.extract_strided_slice %3 {offsets = [456, 0], sizes = [8, 128], strides = [1, 1]} : vector<968x128xf32> to vector<8x128xf32>
    %197 = arith.maximumf %195, %196 : vector<8x128xf32>
    %198 = vector.extract_strided_slice %3 {offsets = [464, 0], sizes = [8, 128], strides = [1, 1]} : vector<968x128xf32> to vector<8x128xf32>
    %199 = arith.maximumf %197, %198 : vector<8x128xf32>
    %200 = vector.extract_strided_slice %3 {offsets = [472, 0], sizes = [8, 128], strides = [1, 1]} : vector<968x128xf32> to vector<8x128xf32>
    %201 = arith.maximumf %199, %200 : vector<8x128xf32>
    %202 = vector.extract_strided_slice %3 {offsets = [544, 0], sizes = [8, 128], strides = [1, 1]} : vector<968x128xf32> to vector<8x128xf32>
    %203 = arith.maximumf %201, %202 : vector<8x128xf32>
    %204 = vector.extract_strided_slice %3 {offsets = [552, 0], sizes = [8, 128], strides = [1, 1]} : vector<968x128xf32> to vector<8x128xf32>
    %205 = arith.maximumf %203, %204 : vector<8x128xf32>
    %206 = vector.extract_strided_slice %3 {offsets = [560, 0], sizes = [8, 128], strides = [1, 1]} : vector<968x128xf32> to vector<8x128xf32>
    %207 = arith.maximumf %205, %206 : vector<8x128xf32>
    %208 = vector.extract_strided_slice %3 {offsets = [384, 0], sizes = [8, 128], strides = [1, 1]} : vector<968x128xf32> to vector<8x128xf32>
    %209 = vector.extract_strided_slice %3 {offsets = [392, 0], sizes = [8, 128], strides = [1, 1]} : vector<968x128xf32> to vector<8x128xf32>
    %210 = arith.maximumf %208, %209 : vector<8x128xf32>
    %211 = vector.extract_strided_slice %3 {offsets = [400, 0], sizes = [8, 128], strides = [1, 1]} : vector<968x128xf32> to vector<8x128xf32>
    %212 = arith.maximumf %210, %211 : vector<8x128xf32>
    %213 = vector.extract_strided_slice %3 {offsets = [472, 0], sizes = [8, 128], strides = [1, 1]} : vector<968x128xf32> to vector<8x128xf32>
    %214 = arith.maximumf %212, %213 : vector<8x128xf32>
    %215 = vector.extract_strided_slice %3 {offsets = [480, 0], sizes = [8, 128], strides = [1, 1]} : vector<968x128xf32> to vector<8x128xf32>
    %216 = arith.maximumf %214, %215 : vector<8x128xf32>
    %217 = vector.extract_strided_slice %3 {offsets = [488, 0], sizes = [8, 128], strides = [1, 1]} : vector<968x128xf32> to vector<8x128xf32>
    %218 = arith.maximumf %216, %217 : vector<8x128xf32>
    %219 = vector.extract_strided_slice %3 {offsets = [560, 0], sizes = [8, 128], strides = [1, 1]} : vector<968x128xf32> to vector<8x128xf32>
    %220 = arith.maximumf %218, %219 : vector<8x128xf32>
    %221 = vector.extract_strided_slice %3 {offsets = [568, 0], sizes = [8, 128], strides = [1, 1]} : vector<968x128xf32> to vector<8x128xf32>
    %222 = arith.maximumf %220, %221 : vector<8x128xf32>
    %223 = vector.extract_strided_slice %3 {offsets = [576, 0], sizes = [8, 128], strides = [1, 1]} : vector<968x128xf32> to vector<8x128xf32>
    %224 = arith.maximumf %222, %223 : vector<8x128xf32>
    %225 = vector.extract_strided_slice %3 {offsets = [400, 0], sizes = [8, 128], strides = [1, 1]} : vector<968x128xf32> to vector<8x128xf32>
    %226 = vector.extract_strided_slice %3 {offsets = [408, 0], sizes = [8, 128], strides = [1, 1]} : vector<968x128xf32> to vector<8x128xf32>
    %227 = arith.maximumf %225, %226 : vector<8x128xf32>
    %228 = vector.extract_strided_slice %3 {offsets = [416, 0], sizes = [8, 128], strides = [1, 1]} : vector<968x128xf32> to vector<8x128xf32>
    %229 = arith.maximumf %227, %228 : vector<8x128xf32>
    %230 = vector.extract_strided_slice %3 {offsets = [488, 0], sizes = [8, 128], strides = [1, 1]} : vector<968x128xf32> to vector<8x128xf32>
    %231 = arith.maximumf %229, %230 : vector<8x128xf32>
    %232 = vector.extract_strided_slice %3 {offsets = [496, 0], sizes = [8, 128], strides = [1, 1]} : vector<968x128xf32> to vector<8x128xf32>
    %233 = arith.maximumf %231, %232 : vector<8x128xf32>
    %234 = vector.extract_strided_slice %3 {offsets = [504, 0], sizes = [8, 128], strides = [1, 1]} : vector<968x128xf32> to vector<8x128xf32>
    %235 = arith.maximumf %233, %234 : vector<8x128xf32>
    %236 = vector.extract_strided_slice %3 {offsets = [576, 0], sizes = [8, 128], strides = [1, 1]} : vector<968x128xf32> to vector<8x128xf32>
    %237 = arith.maximumf %235, %236 : vector<8x128xf32>
    %238 = vector.extract_strided_slice %3 {offsets = [584, 0], sizes = [8, 128], strides = [1, 1]} : vector<968x128xf32> to vector<8x128xf32>
    %239 = arith.maximumf %237, %238 : vector<8x128xf32>
    %240 = vector.extract_strided_slice %3 {offsets = [592, 0], sizes = [8, 128], strides = [1, 1]} : vector<968x128xf32> to vector<8x128xf32>
    %241 = arith.maximumf %239, %240 : vector<8x128xf32>
    %242 = vector.extract_strided_slice %3 {offsets = [416, 0], sizes = [8, 128], strides = [1, 1]} : vector<968x128xf32> to vector<8x128xf32>
    %243 = vector.extract_strided_slice %3 {offsets = [424, 0], sizes = [8, 128], strides = [1, 1]} : vector<968x128xf32> to vector<8x128xf32>
    %244 = arith.maximumf %242, %243 : vector<8x128xf32>
    %245 = vector.extract_strided_slice %3 {offsets = [432, 0], sizes = [8, 128], strides = [1, 1]} : vector<968x128xf32> to vector<8x128xf32>
    %246 = arith.maximumf %244, %245 : vector<8x128xf32>
    %247 = vector.extract_strided_slice %3 {offsets = [504, 0], sizes = [8, 128], strides = [1, 1]} : vector<968x128xf32> to vector<8x128xf32>
    %248 = arith.maximumf %246, %247 : vector<8x128xf32>
    %249 = vector.extract_strided_slice %3 {offsets = [512, 0], sizes = [8, 128], strides = [1, 1]} : vector<968x128xf32> to vector<8x128xf32>
    %250 = arith.maximumf %248, %249 : vector<8x128xf32>
    %251 = vector.extract_strided_slice %3 {offsets = [520, 0], sizes = [8, 128], strides = [1, 1]} : vector<968x128xf32> to vector<8x128xf32>
    %252 = arith.maximumf %250, %251 : vector<8x128xf32>
    %253 = vector.extract_strided_slice %3 {offsets = [592, 0], sizes = [8, 128], strides = [1, 1]} : vector<968x128xf32> to vector<8x128xf32>
    %254 = arith.maximumf %252, %253 : vector<8x128xf32>
    %255 = vector.extract_strided_slice %3 {offsets = [600, 0], sizes = [8, 128], strides = [1, 1]} : vector<968x128xf32> to vector<8x128xf32>
    %256 = arith.maximumf %254, %255 : vector<8x128xf32>
    %257 = vector.extract_strided_slice %3 {offsets = [608, 0], sizes = [8, 128], strides = [1, 1]} : vector<968x128xf32> to vector<8x128xf32>
    %258 = arith.maximumf %256, %257 : vector<8x128xf32>
    %259 = vector.extract_strided_slice %3 {offsets = [528, 0], sizes = [8, 128], strides = [1, 1]} : vector<968x128xf32> to vector<8x128xf32>
    %260 = vector.extract_strided_slice %3 {offsets = [536, 0], sizes = [8, 128], strides = [1, 1]} : vector<968x128xf32> to vector<8x128xf32>
    %261 = arith.maximumf %259, %260 : vector<8x128xf32>
    %262 = vector.extract_strided_slice %3 {offsets = [544, 0], sizes = [8, 128], strides = [1, 1]} : vector<968x128xf32> to vector<8x128xf32>
    %263 = arith.maximumf %261, %262 : vector<8x128xf32>
    %264 = vector.extract_strided_slice %3 {offsets = [616, 0], sizes = [8, 128], strides = [1, 1]} : vector<968x128xf32> to vector<8x128xf32>
    %265 = arith.maximumf %263, %264 : vector<8x128xf32>
    %266 = vector.extract_strided_slice %3 {offsets = [624, 0], sizes = [8, 128], strides = [1, 1]} : vector<968x128xf32> to vector<8x128xf32>
    %267 = arith.maximumf %265, %266 : vector<8x128xf32>
    %268 = vector.extract_strided_slice %3 {offsets = [632, 0], sizes = [8, 128], strides = [1, 1]} : vector<968x128xf32> to vector<8x128xf32>
    %269 = arith.maximumf %267, %268 : vector<8x128xf32>
    %270 = vector.extract_strided_slice %3 {offsets = [704, 0], sizes = [8, 128], strides = [1, 1]} : vector<968x128xf32> to vector<8x128xf32>
    %271 = arith.maximumf %269, %270 : vector<8x128xf32>
    %272 = vector.extract_strided_slice %3 {offsets = [712, 0], sizes = [8, 128], strides = [1, 1]} : vector<968x128xf32> to vector<8x128xf32>
    %273 = arith.maximumf %271, %272 : vector<8x128xf32>
    %274 = vector.extract_strided_slice %3 {offsets = [720, 0], sizes = [8, 128], strides = [1, 1]} : vector<968x128xf32> to vector<8x128xf32>
    %275 = arith.maximumf %273, %274 : vector<8x128xf32>
    %276 = vector.extract_strided_slice %3 {offsets = [544, 0], sizes = [8, 128], strides = [1, 1]} : vector<968x128xf32> to vector<8x128xf32>
    %277 = vector.extract_strided_slice %3 {offsets = [552, 0], sizes = [8, 128], strides = [1, 1]} : vector<968x128xf32> to vector<8x128xf32>
    %278 = arith.maximumf %276, %277 : vector<8x128xf32>
    %279 = vector.extract_strided_slice %3 {offsets = [560, 0], sizes = [8, 128], strides = [1, 1]} : vector<968x128xf32> to vector<8x128xf32>
    %280 = arith.maximumf %278, %279 : vector<8x128xf32>
    %281 = vector.extract_strided_slice %3 {offsets = [632, 0], sizes = [8, 128], strides = [1, 1]} : vector<968x128xf32> to vector<8x128xf32>
    %282 = arith.maximumf %280, %281 : vector<8x128xf32>
    %283 = vector.extract_strided_slice %3 {offsets = [640, 0], sizes = [8, 128], strides = [1, 1]} : vector<968x128xf32> to vector<8x128xf32>
    %284 = arith.maximumf %282, %283 : vector<8x128xf32>
    %285 = vector.extract_strided_slice %3 {offsets = [648, 0], sizes = [8, 128], strides = [1, 1]} : vector<968x128xf32> to vector<8x128xf32>
    %286 = arith.maximumf %284, %285 : vector<8x128xf32>
    %287 = vector.extract_strided_slice %3 {offsets = [720, 0], sizes = [8, 128], strides = [1, 1]} : vector<968x128xf32> to vector<8x128xf32>
    %288 = arith.maximumf %286, %287 : vector<8x128xf32>
    %289 = vector.extract_strided_slice %3 {offsets = [728, 0], sizes = [8, 128], strides = [1, 1]} : vector<968x128xf32> to vector<8x128xf32>
    %290 = arith.maximumf %288, %289 : vector<8x128xf32>
    %291 = vector.extract_strided_slice %3 {offsets = [736, 0], sizes = [8, 128], strides = [1, 1]} : vector<968x128xf32> to vector<8x128xf32>
    %292 = arith.maximumf %290, %291 : vector<8x128xf32>
    %293 = vector.extract_strided_slice %3 {offsets = [560, 0], sizes = [8, 128], strides = [1, 1]} : vector<968x128xf32> to vector<8x128xf32>
    %294 = vector.extract_strided_slice %3 {offsets = [568, 0], sizes = [8, 128], strides = [1, 1]} : vector<968x128xf32> to vector<8x128xf32>
    %295 = arith.maximumf %293, %294 : vector<8x128xf32>
    %296 = vector.extract_strided_slice %3 {offsets = [576, 0], sizes = [8, 128], strides = [1, 1]} : vector<968x128xf32> to vector<8x128xf32>
    %297 = arith.maximumf %295, %296 : vector<8x128xf32>
    %298 = vector.extract_strided_slice %3 {offsets = [648, 0], sizes = [8, 128], strides = [1, 1]} : vector<968x128xf32> to vector<8x128xf32>
    %299 = arith.maximumf %297, %298 : vector<8x128xf32>
    %300 = vector.extract_strided_slice %3 {offsets = [656, 0], sizes = [8, 128], strides = [1, 1]} : vector<968x128xf32> to vector<8x128xf32>
    %301 = arith.maximumf %299, %300 : vector<8x128xf32>
    %302 = vector.extract_strided_slice %3 {offsets = [664, 0], sizes = [8, 128], strides = [1, 1]} : vector<968x128xf32> to vector<8x128xf32>
    %303 = arith.maximumf %301, %302 : vector<8x128xf32>
    %304 = vector.extract_strided_slice %3 {offsets = [736, 0], sizes = [8, 128], strides = [1, 1]} : vector<968x128xf32> to vector<8x128xf32>
    %305 = arith.maximumf %303, %304 : vector<8x128xf32>
    %306 = vector.extract_strided_slice %3 {offsets = [744, 0], sizes = [8, 128], strides = [1, 1]} : vector<968x128xf32> to vector<8x128xf32>
    %307 = arith.maximumf %305, %306 : vector<8x128xf32>
    %308 = vector.extract_strided_slice %3 {offsets = [752, 0], sizes = [8, 128], strides = [1, 1]} : vector<968x128xf32> to vector<8x128xf32>
    %309 = arith.maximumf %307, %308 : vector<8x128xf32>
    %310 = vector.extract_strided_slice %3 {offsets = [576, 0], sizes = [8, 128], strides = [1, 1]} : vector<968x128xf32> to vector<8x128xf32>
    %311 = vector.extract_strided_slice %3 {offsets = [584, 0], sizes = [8, 128], strides = [1, 1]} : vector<968x128xf32> to vector<8x128xf32>
    %312 = arith.maximumf %310, %311 : vector<8x128xf32>
    %313 = vector.extract_strided_slice %3 {offsets = [592, 0], sizes = [8, 128], strides = [1, 1]} : vector<968x128xf32> to vector<8x128xf32>
    %314 = arith.maximumf %312, %313 : vector<8x128xf32>
    %315 = vector.extract_strided_slice %3 {offsets = [664, 0], sizes = [8, 128], strides = [1, 1]} : vector<968x128xf32> to vector<8x128xf32>
    %316 = arith.maximumf %314, %315 : vector<8x128xf32>
    %317 = vector.extract_strided_slice %3 {offsets = [672, 0], sizes = [8, 128], strides = [1, 1]} : vector<968x128xf32> to vector<8x128xf32>
    %318 = arith.maximumf %316, %317 : vector<8x128xf32>
    %319 = vector.extract_strided_slice %3 {offsets = [680, 0], sizes = [8, 128], strides = [1, 1]} : vector<968x128xf32> to vector<8x128xf32>
    %320 = arith.maximumf %318, %319 : vector<8x128xf32>
    %321 = vector.extract_strided_slice %3 {offsets = [752, 0], sizes = [8, 128], strides = [1, 1]} : vector<968x128xf32> to vector<8x128xf32>
    %322 = arith.maximumf %320, %321 : vector<8x128xf32>
    %323 = vector.extract_strided_slice %3 {offsets = [760, 0], sizes = [8, 128], strides = [1, 1]} : vector<968x128xf32> to vector<8x128xf32>
    %324 = arith.maximumf %322, %323 : vector<8x128xf32>
    %325 = vector.extract_strided_slice %3 {offsets = [768, 0], sizes = [8, 128], strides = [1, 1]} : vector<968x128xf32> to vector<8x128xf32>
    %326 = arith.maximumf %324, %325 : vector<8x128xf32>
    %327 = vector.extract_strided_slice %3 {offsets = [592, 0], sizes = [8, 128], strides = [1, 1]} : vector<968x128xf32> to vector<8x128xf32>
    %328 = vector.extract_strided_slice %3 {offsets = [600, 0], sizes = [8, 128], strides = [1, 1]} : vector<968x128xf32> to vector<8x128xf32>
    %329 = arith.maximumf %327, %328 : vector<8x128xf32>
    %330 = vector.extract_strided_slice %3 {offsets = [608, 0], sizes = [8, 128], strides = [1, 1]} : vector<968x128xf32> to vector<8x128xf32>
    %331 = arith.maximumf %329, %330 : vector<8x128xf32>
    %332 = vector.extract_strided_slice %3 {offsets = [680, 0], sizes = [8, 128], strides = [1, 1]} : vector<968x128xf32> to vector<8x128xf32>
    %333 = arith.maximumf %331, %332 : vector<8x128xf32>
    %334 = vector.extract_strided_slice %3 {offsets = [688, 0], sizes = [8, 128], strides = [1, 1]} : vector<968x128xf32> to vector<8x128xf32>
    %335 = arith.maximumf %333, %334 : vector<8x128xf32>
    %336 = vector.extract_strided_slice %3 {offsets = [696, 0], sizes = [8, 128], strides = [1, 1]} : vector<968x128xf32> to vector<8x128xf32>
    %337 = arith.maximumf %335, %336 : vector<8x128xf32>
    %338 = vector.extract_strided_slice %3 {offsets = [768, 0], sizes = [8, 128], strides = [1, 1]} : vector<968x128xf32> to vector<8x128xf32>
    %339 = arith.maximumf %337, %338 : vector<8x128xf32>
    %340 = vector.extract_strided_slice %3 {offsets = [776, 0], sizes = [8, 128], strides = [1, 1]} : vector<968x128xf32> to vector<8x128xf32>
    %341 = arith.maximumf %339, %340 : vector<8x128xf32>
    %342 = vector.extract_strided_slice %3 {offsets = [784, 0], sizes = [8, 128], strides = [1, 1]} : vector<968x128xf32> to vector<8x128xf32>
    %343 = arith.maximumf %341, %342 : vector<8x128xf32>
    %344 = vector.extract_strided_slice %3 {offsets = [704, 0], sizes = [8, 128], strides = [1, 1]} : vector<968x128xf32> to vector<8x128xf32>
    %345 = vector.extract_strided_slice %3 {offsets = [712, 0], sizes = [8, 128], strides = [1, 1]} : vector<968x128xf32> to vector<8x128xf32>
    %346 = arith.maximumf %344, %345 : vector<8x128xf32>
    %347 = vector.extract_strided_slice %3 {offsets = [720, 0], sizes = [8, 128], strides = [1, 1]} : vector<968x128xf32> to vector<8x128xf32>
    %348 = arith.maximumf %346, %347 : vector<8x128xf32>
    %349 = vector.extract_strided_slice %3 {offsets = [792, 0], sizes = [8, 128], strides = [1, 1]} : vector<968x128xf32> to vector<8x128xf32>
    %350 = arith.maximumf %348, %349 : vector<8x128xf32>
    %351 = vector.extract_strided_slice %3 {offsets = [800, 0], sizes = [8, 128], strides = [1, 1]} : vector<968x128xf32> to vector<8x128xf32>
    %352 = arith.maximumf %350, %351 : vector<8x128xf32>
    %353 = vector.extract_strided_slice %3 {offsets = [808, 0], sizes = [8, 128], strides = [1, 1]} : vector<968x128xf32> to vector<8x128xf32>
    %354 = arith.maximumf %352, %353 : vector<8x128xf32>
    %355 = vector.extract_strided_slice %3 {offsets = [880, 0], sizes = [8, 128], strides = [1, 1]} : vector<968x128xf32> to vector<8x128xf32>
    %356 = arith.maximumf %354, %355 : vector<8x128xf32>
    %357 = vector.extract_strided_slice %3 {offsets = [888, 0], sizes = [8, 128], strides = [1, 1]} : vector<968x128xf32> to vector<8x128xf32>
    %358 = arith.maximumf %356, %357 : vector<8x128xf32>
    %359 = vector.extract_strided_slice %3 {offsets = [896, 0], sizes = [8, 128], strides = [1, 1]} : vector<968x128xf32> to vector<8x128xf32>
    %360 = arith.maximumf %358, %359 : vector<8x128xf32>
    %361 = vector.extract_strided_slice %3 {offsets = [720, 0], sizes = [8, 128], strides = [1, 1]} : vector<968x128xf32> to vector<8x128xf32>
    %362 = vector.extract_strided_slice %3 {offsets = [728, 0], sizes = [8, 128], strides = [1, 1]} : vector<968x128xf32> to vector<8x128xf32>
    %363 = arith.maximumf %361, %362 : vector<8x128xf32>
    %364 = vector.extract_strided_slice %3 {offsets = [736, 0], sizes = [8, 128], strides = [1, 1]} : vector<968x128xf32> to vector<8x128xf32>
    %365 = arith.maximumf %363, %364 : vector<8x128xf32>
    %366 = vector.extract_strided_slice %3 {offsets = [808, 0], sizes = [8, 128], strides = [1, 1]} : vector<968x128xf32> to vector<8x128xf32>
    %367 = arith.maximumf %365, %366 : vector<8x128xf32>
    %368 = vector.extract_strided_slice %3 {offsets = [816, 0], sizes = [8, 128], strides = [1, 1]} : vector<968x128xf32> to vector<8x128xf32>
    %369 = arith.maximumf %367, %368 : vector<8x128xf32>
    %370 = vector.extract_strided_slice %3 {offsets = [824, 0], sizes = [8, 128], strides = [1, 1]} : vector<968x128xf32> to vector<8x128xf32>
    %371 = arith.maximumf %369, %370 : vector<8x128xf32>
    %372 = vector.extract_strided_slice %3 {offsets = [896, 0], sizes = [8, 128], strides = [1, 1]} : vector<968x128xf32> to vector<8x128xf32>
    %373 = arith.maximumf %371, %372 : vector<8x128xf32>
    %374 = vector.extract_strided_slice %3 {offsets = [904, 0], sizes = [8, 128], strides = [1, 1]} : vector<968x128xf32> to vector<8x128xf32>
    %375 = arith.maximumf %373, %374 : vector<8x128xf32>
    %376 = vector.extract_strided_slice %3 {offsets = [912, 0], sizes = [8, 128], strides = [1, 1]} : vector<968x128xf32> to vector<8x128xf32>
    %377 = arith.maximumf %375, %376 : vector<8x128xf32>
    %378 = vector.extract_strided_slice %3 {offsets = [736, 0], sizes = [8, 128], strides = [1, 1]} : vector<968x128xf32> to vector<8x128xf32>
    %379 = vector.extract_strided_slice %3 {offsets = [744, 0], sizes = [8, 128], strides = [1, 1]} : vector<968x128xf32> to vector<8x128xf32>
    %380 = arith.maximumf %378, %379 : vector<8x128xf32>
    %381 = vector.extract_strided_slice %3 {offsets = [752, 0], sizes = [8, 128], strides = [1, 1]} : vector<968x128xf32> to vector<8x128xf32>
    %382 = arith.maximumf %380, %381 : vector<8x128xf32>
    %383 = vector.extract_strided_slice %3 {offsets = [824, 0], sizes = [8, 128], strides = [1, 1]} : vector<968x128xf32> to vector<8x128xf32>
    %384 = arith.maximumf %382, %383 : vector<8x128xf32>
    %385 = vector.extract_strided_slice %3 {offsets = [832, 0], sizes = [8, 128], strides = [1, 1]} : vector<968x128xf32> to vector<8x128xf32>
    %386 = arith.maximumf %384, %385 : vector<8x128xf32>
    %387 = vector.extract_strided_slice %3 {offsets = [840, 0], sizes = [8, 128], strides = [1, 1]} : vector<968x128xf32> to vector<8x128xf32>
    %388 = arith.maximumf %386, %387 : vector<8x128xf32>
    %389 = vector.extract_strided_slice %3 {offsets = [912, 0], sizes = [8, 128], strides = [1, 1]} : vector<968x128xf32> to vector<8x128xf32>
    %390 = arith.maximumf %388, %389 : vector<8x128xf32>
    %391 = vector.extract_strided_slice %3 {offsets = [920, 0], sizes = [8, 128], strides = [1, 1]} : vector<968x128xf32> to vector<8x128xf32>
    %392 = arith.maximumf %390, %391 : vector<8x128xf32>
    %393 = vector.extract_strided_slice %3 {offsets = [928, 0], sizes = [8, 128], strides = [1, 1]} : vector<968x128xf32> to vector<8x128xf32>
    %394 = arith.maximumf %392, %393 : vector<8x128xf32>
    %395 = vector.extract_strided_slice %3 {offsets = [752, 0], sizes = [8, 128], strides = [1, 1]} : vector<968x128xf32> to vector<8x128xf32>
    %396 = vector.extract_strided_slice %3 {offsets = [760, 0], sizes = [8, 128], strides = [1, 1]} : vector<968x128xf32> to vector<8x128xf32>
    %397 = arith.maximumf %395, %396 : vector<8x128xf32>
    %398 = vector.extract_strided_slice %3 {offsets = [768, 0], sizes = [8, 128], strides = [1, 1]} : vector<968x128xf32> to vector<8x128xf32>
    %399 = arith.maximumf %397, %398 : vector<8x128xf32>
    %400 = vector.extract_strided_slice %3 {offsets = [840, 0], sizes = [8, 128], strides = [1, 1]} : vector<968x128xf32> to vector<8x128xf32>
    %401 = arith.maximumf %399, %400 : vector<8x128xf32>
    %402 = vector.extract_strided_slice %3 {offsets = [848, 0], sizes = [8, 128], strides = [1, 1]} : vector<968x128xf32> to vector<8x128xf32>
    %403 = arith.maximumf %401, %402 : vector<8x128xf32>
    %404 = vector.extract_strided_slice %3 {offsets = [856, 0], sizes = [8, 128], strides = [1, 1]} : vector<968x128xf32> to vector<8x128xf32>
    %405 = arith.maximumf %403, %404 : vector<8x128xf32>
    %406 = vector.extract_strided_slice %3 {offsets = [928, 0], sizes = [8, 128], strides = [1, 1]} : vector<968x128xf32> to vector<8x128xf32>
    %407 = arith.maximumf %405, %406 : vector<8x128xf32>
    %408 = vector.extract_strided_slice %3 {offsets = [936, 0], sizes = [8, 128], strides = [1, 1]} : vector<968x128xf32> to vector<8x128xf32>
    %409 = arith.maximumf %407, %408 : vector<8x128xf32>
    %410 = vector.extract_strided_slice %3 {offsets = [944, 0], sizes = [8, 128], strides = [1, 1]} : vector<968x128xf32> to vector<8x128xf32>
    %411 = arith.maximumf %409, %410 : vector<8x128xf32>
    %412 = vector.extract_strided_slice %3 {offsets = [768, 0], sizes = [8, 128], strides = [1, 1]} : vector<968x128xf32> to vector<8x128xf32>
    %413 = vector.extract_strided_slice %3 {offsets = [776, 0], sizes = [8, 128], strides = [1, 1]} : vector<968x128xf32> to vector<8x128xf32>
    %414 = arith.maximumf %412, %413 : vector<8x128xf32>
    %415 = vector.extract_strided_slice %3 {offsets = [784, 0], sizes = [8, 128], strides = [1, 1]} : vector<968x128xf32> to vector<8x128xf32>
    %416 = arith.maximumf %414, %415 : vector<8x128xf32>
    %417 = vector.extract_strided_slice %3 {offsets = [856, 0], sizes = [8, 128], strides = [1, 1]} : vector<968x128xf32> to vector<8x128xf32>
    %418 = arith.maximumf %416, %417 : vector<8x128xf32>
    %419 = vector.extract_strided_slice %3 {offsets = [864, 0], sizes = [8, 128], strides = [1, 1]} : vector<968x128xf32> to vector<8x128xf32>
    %420 = arith.maximumf %418, %419 : vector<8x128xf32>
    %421 = vector.extract_strided_slice %3 {offsets = [872, 0], sizes = [8, 128], strides = [1, 1]} : vector<968x128xf32> to vector<8x128xf32>
    %422 = arith.maximumf %420, %421 : vector<8x128xf32>
    %423 = vector.extract_strided_slice %3 {offsets = [944, 0], sizes = [8, 128], strides = [1, 1]} : vector<968x128xf32> to vector<8x128xf32>
    %424 = arith.maximumf %422, %423 : vector<8x128xf32>
    %425 = vector.extract_strided_slice %3 {offsets = [952, 0], sizes = [8, 128], strides = [1, 1]} : vector<968x128xf32> to vector<8x128xf32>
    %426 = arith.maximumf %424, %425 : vector<8x128xf32>
    %427 = vector.extract_strided_slice %3 {offsets = [960, 0], sizes = [8, 128], strides = [1, 1]} : vector<968x128xf32> to vector<8x128xf32>
    %428 = arith.maximumf %426, %427 : vector<8x128xf32>
    %429 = tpu.concatenate %20, %37, %54, %71, %88, %105, %122, %139, %156, %173, %190, %207, %224, %241, %258, %275 in 1 : vector<8x128xf32>, vector<8x128xf32>, vector<8x128xf32>, vector<8x128xf32>, vector<8x128xf32>, vector<8x128xf32>, vector<8x128xf32>, vector<8x128xf32>, vector<8x128xf32>, vector<8x128xf32>, vector<8x128xf32>, vector<8x128xf32>, vector<8x128xf32>, vector<8x128xf32>, vector<8x128xf32>, vector<8x128xf32> -> vector<8x2048xf32>
    %430 = tpu.concatenate %292, %309, %326, %343, %360, %377, %394, %411, %428 in 1 : vector<8x128xf32>, vector<8x128xf32>, vector<8x128xf32>, vector<8x128xf32>, vector<8x128xf32>, vector<8x128xf32>, vector<8x128xf32>, vector<8x128xf32>, vector<8x128xf32> -> vector<8x1152xf32>
    %431 = tpu.concatenate %429, %430 in 1 : vector<8x2048xf32>, vector<8x1152xf32> -> vector<8x3200xf32>
    %c0_4 = arith.constant 0 : index
    %c0_5 = arith.constant 0 : index
    %432 = vector.load %arg3[%c0_4, %c0_5] : memref<1x3200xf32, #tpu.memory_space<vmem>>, vector<1x3200xf32>
    %433 = vector.broadcast %432 : vector<1x3200xf32> to vector<8x3200xf32>
    %434 = arith.addf %431, %433 : vector<8x3200xf32>
    %cst_6 = arith.constant 0.000000e+00 : f32
    %435 = vector.broadcast %cst_6 : f32 to vector<8x3200xf32>
    %436 = arith.maximumf %434, %435 : vector<8x3200xf32>
    %437 = arith.truncf %436 : vector<8x3200xf32> to vector<8x3200xbf16>
    %c0_7 = arith.constant 0 : index
    %c0_8 = arith.constant 0 : index
    %438 = vector.load %arg4[%c0_7, %c0_8] : memref<3200x128xbf16, #tpu.memory_space<vmem>>, vector<3200x128xbf16>
    %cst_9 = arith.constant dense<0.000000e+00> : vector<8x128xf32>
    %439 = tpu.matmul %437, %438, %cst_9 {dimension_numbers = #tpu.dot_dimension_numbers<[1], [0], [0], [1], [0, 0, 1, 1], [], []>} : vector<8x3200xbf16>, vector<3200x128xbf16>, vector<8x128xf32> -> vector<8x128xf32>
    %c0_10 = arith.constant 0 : index
    %c0_11 = arith.constant 0 : index
    %440 = vector.load %arg5[%c0_10, %c0_11] : memref<1x128xf32, #tpu.memory_space<vmem>>, vector<1x128xf32>
    %441 = vector.broadcast %440 : vector<1x128xf32> to vector<8x128xf32>
    %442 = arith.addf %439, %441 : vector<8x128xf32>
    %cst_12 = arith.constant 0.000000e+00 : f32
    %443 = vector.broadcast %cst_12 : f32 to vector<8x128xf32>
    %444 = arith.maximumf %442, %443 : vector<8x128xf32>
    %c0_13 = arith.constant 0 : index
    %c0_14 = arith.constant 0 : index
    %445 = vector.load %arg6[%c0_13, %c0_14] : memref<8x128xf32, #tpu.memory_space<vmem>>, vector<8x128xf32>
    tpu.vector_store %arg6[%c0_13, %c0_14], %444 {strides = array<i32>} : memref<8x128xf32, #tpu.memory_space<vmem>>, vector<8x128xf32>,
    return
  }
  func.func @transform_0(%arg0: i32) -> (i32, i32, i32) {
    %c0_i32 = arith.constant 0 : i32
    %c0_i32_0 = arith.constant 0 : i32
    %c0_i32_1 = arith.constant 0 : i32
    return %arg0, %c0_i32, %c0_i32_0 : i32, i32, i32
  }
  func.func @transform_1(%arg0: i32) -> (i32, i32) {
    %c0_i32 = arith.constant 0 : i32
    %c0_i32_0 = arith.constant 0 : i32
    %c0_i32_1 = arith.constant 0 : i32
    return %c0_i32, %c0_i32_0 : i32, i32
  }
  func.func @transform_2(%arg0: i32) -> (i32, i32) {
    %c0_i32 = arith.constant 0 : i32
    %c0_i32_0 = arith.constant 0 : i32
    %c0_i32_1 = arith.constant 0 : i32
    return %c0_i32, %c0_i32_0 : i32, i32
  }
  func.func @transform_3(%arg0: i32) -> (i32, i32) {
    %c0_i32 = arith.constant 0 : i32
    %c0_i32_0 = arith.constant 0 : i32
    %c0_i32_1 = arith.constant 0 : i32
    return %c0_i32, %c0_i32_0 : i32, i32
  }
  func.func @transform_4(%arg0: i32) -> (i32, i32) {
    %c0_i32 = arith.constant 0 : i32
    %c0_i32_0 = arith.constant 0 : i32
    %c0_i32_1 = arith.constant 0 : i32
    return %c0_i32, %c0_i32_0 : i32, i32
  }
  func.func @transform_5(%arg0: i32) -> (i32, i32) {
    %c0_i32 = arith.constant 0 : i32
    %c0_i32_0 = arith.constant 0 : i32
    return %arg0, %c0_i32 : i32, i32
  }
}

</mosaic_0001>

<bundles_post_ra>
// kernel: net_forward.1
= control target key start
LH: loop header
LB: loop body
LE: loop exit
PB: predicated region body
PF: predicated region fallthrough
CT: control target
= control target key end

     0   :  { %vm477_vm0 = vcmask 523264   ;;  %s5949_s1 = inlined_call_operand.vmem [shape: bf16[64,128], index: 1, kind: input, shape index: {}]   ;;  %s5950_s0 = inlined_call_operand.vmem [shape: bf16[1,968,64], index: 0, kind: input, shape index: {}]   ;;  %s5951_s2 = inlined_call_operand.vmem [shape: f32[1,3200], index: 2, kind: input, shape index: {}]   ;;  %s5952_s3 = inlined_call_operand.vmem [shape: bf16[3200,128], index: 3, kind: input, shape index: {}]   ;;  %s5953_s4 = inlined_call_operand.vmem [shape: f32[1,128], index: 4, kind: input, shape index: {}]   ;;  %s5954_s5 = inlined_call_operand.vmem [shape: f32[8,128], index: 5, kind: output, shape index: {}]  }
   0x1   :  { %v4422_v0 = vld [vmem:[%s5949_s1 + $0x18] sm:$0xff]  ;;  %v4421_v1 = vld [vmem:[%s5949_s1 + $0x10] sm:$0xff]  ;;  %v4420_v2 = vld [vmem:[%s5949_s1 + $0x8] sm:$0xff] }
   0x2   :  { %665 = vmatpush.bf16.msra.mxu0 %v4422_v0  ;;  %4624 = vmatpush.bf16.msra.mxu2 %v4422_v0  ;;  %v4419_v3 = vld [vmem:[%s5949_s1] sm:$0xff]  ;;  %v4360_v5 = vld [vmem:[%s5950_s0 + $0x8] sm:$0xff]  ;;  %v4361_v6 = vld [vmem:[%s5950_s0 + $0x10] sm:$0xff] }
   0x3   :  { %4625 = vmatpush.bf16.msra.mxu3 %v4422_v0  ;;  %4623 = vmatpush.bf16.msra.mxu1 %v4422_v0  ;;  %v4359_v4 = vld [vmem:[%s5950_s0] sm:$0xff]  ;;  %v4362_v7 = vld [vmem:[%s5950_s0 + $0x18] sm:$0xff]  ;;  %v4364_v10 = vld [vmem:[%s5950_s0 + $0x28] sm:$0xff] }
   0x4   :  { %v4363_v8 = vld [vmem:[%s5950_s0 + $0x20] sm:$0xff]  ;;  %v4396_v11 = vld [vmem:[%s5950_s0 + $0x128] sm:$0xff]  ;;  %v4365_v12 = vld [vmem:[%s5950_s0 + $0x30] sm:$0xff] }
   0x5   :  { %v4395_v9 = vld [vmem:[%s5950_s0 + $0x120] sm:$0xff]  ;;  %v4397_v13 = vld [vmem:[%s5950_s0 + $0x130] sm:$0xff]  ;;  %v4366_v14 = vld [vmem:[%s5950_s0 + $0x38] sm:$0xff] }
   0x6   :  { %666 = vmatpush.bf16.msra.mxu0 %v4421_v1  ;;  %4627 = vmatpush.bf16.msra.mxu2 %v4421_v1  ;;  %v4408_v15 = vld [vmem:[%s5950_s0 + $0x188] sm:$0xff]  ;;  %v4398_v16 = vld [vmem:[%s5950_s0 + $0x138] sm:$0xff]  ;;  %v4367_v17 = vld [vmem:[%s5950_s0 + $0x40] sm:$0xff] }
   0x7   :  { %4628 = vmatpush.bf16.msra.mxu3 %v4421_v1  ;;  %4626 = vmatpush.bf16.msra.mxu1 %v4421_v1  ;;  %v4409_v19 = vld [vmem:[%s5950_s0 + $0x190] sm:$0xff]  ;;  %v4399_v22 = vld [vmem:[%s5950_s0 + $0x140] sm:$0xff]  ;;  %v4368_v23 = vld [vmem:[%s5950_s0 + $0x48] sm:$0xff] }
   0x8   :  { %v4387_v26 = vld [vmem:[%s5950_s0 + $0xe0] sm:$0xff]  ;;  %v4410_v27 = vld [vmem:[%s5950_s0 + $0x198] sm:$0xff]  ;;  %v4400_v30 = vld [vmem:[%s5950_s0 + $0x148] sm:$0xff] }
   0x9   :  { %v4369_v31 = vld [vmem:[%s5950_s0 + $0x50] sm:$0xff]  ;;  %v4388_v34 = vld [vmem:[%s5950_s0 + $0xe8] sm:$0xff]  ;;  %v4411_v35 = vld [vmem:[%s5950_s0 + $0x1a0] sm:$0xff] }
   0xa   :  { %667 = vmatpush.bf16.msra.mxu0 %v4420_v2  ;;  %4630 = vmatpush.bf16.msra.mxu2 %v4420_v2  ;;  %v4401_v38 = vld [vmem:[%s5950_s0 + $0x150] sm:$0xff]  ;;  %v4370_v39 = vld [vmem:[%s5950_s0 + $0x58] sm:$0xff]  ;;  %v4412_v43 = vld [vmem:[%s5950_s0 + $0x1a8] sm:$0xff] }
   0xb   :  { %4631 = vmatpush.bf16.msra.mxu3 %v4420_v2  ;;  %4629 = vmatpush.bf16.msra.mxu1 %v4420_v2  ;;  %v4389_v42 = vld [vmem:[%s5950_s0 + $0xf0] sm:$0xff]  ;;  %v4402_v46 = vld [vmem:[%s5950_s0 + $0x158] sm:$0xff]  ;;  %v4371_v47 = vld [vmem:[%s5950_s0 + $0x60] sm:$0xff] }
   0xc   :  { %v4390_v50 = vld [vmem:[%s5950_s0 + $0xf8] sm:$0xff]  ;;  %v4413_v51 = vld [vmem:[%s5950_s0 + $0x1b0] sm:$0xff]  ;;  %v4403_v54 = vld [vmem:[%s5950_s0 + $0x160] sm:$0xff] }
   0xd   :  { %v4372_v55 = vld [vmem:[%s5950_s0 + $0x68] sm:$0xff]  ;;  %v4391_v59 = vld [vmem:[%s5950_s0 + $0x100] sm:$0xff]  ;;  %v4414_v60 = vld [vmem:[%s5950_s0 + $0x1b8] sm:$0xff] }
   0xe   :  { %668 = vmatpush.bf16.msra.mxu0 %v4419_v3  ;;  %4633 = vmatpush.bf16.msra.mxu2 %v4419_v3  ;;  %v4404_v0 = vld [vmem:[%s5950_s0 + $0x168] sm:$0xff]  ;;  %v4373_v1 = vld [vmem:[%s5950_s0 + $0x70] sm:$0xff] }
   0xf   :  { %4634 = vmatpush.bf16.msra.mxu3 %v4419_v3  ;;  %4632 = vmatpush.bf16.msra.mxu1 %v4419_v3 }
  0x11   :  { %3498 = vmatmul.msk.bf16.vlgmr.msra.gmra.mxu0 %vm477_vm0, %v4359_v4  ;;  %3534 = vmatmul.msk.bf16.vlgmr.msra.gmra.mxu2 %vm477_vm0, %v4395_v9 }
  0x12   :  { %3547 = vmatmul.msk.bf16.vlgmr.msra.gmra.mxu3 %vm477_vm0, %v4408_v15  ;;  %3526 = vmatmul.msk.bf16.vlgmr.msra.gmra.mxu1 %vm477_vm0, %v4387_v26 }
  0x21   :  { %3499 = vmatmul.msk.bf16.gmra.mxu0 %vm477_vm0, %v4360_v5  ;;  %3535 = vmatmul.msk.bf16.gmra.mxu2 %vm477_vm0, %v4396_v11  ;;  %v4392_v5 = vld [vmem:[%s5950_s0 + $0x108] sm:$0xff]  ;;  %v4405_v11 = vld [vmem:[%s5950_s0 + $0x170] sm:$0xff] }
  0x22   :  { %3548 = vmatmul.msk.bf16.gmra.mxu3 %vm477_vm0, %v4409_v19  ;;  %3527 = vmatmul.msk.bf16.gmra.mxu1 %vm477_vm0, %v4388_v34 }
  0x31   :  { %3500 = vmatmul.msk.bf16.gmra.mxu0 %vm477_vm0, %v4361_v6  ;;  %3536 = vmatmul.msk.bf16.gmra.mxu2 %vm477_vm0, %v4397_v13  ;;  %v4415_v6 = vld [vmem:[%s5950_s0 + $0x1c0] sm:$0xff] }
  0x32   :  { %3549 = vmatmul.msk.bf16.gmra.mxu3 %vm477_vm0, %v4410_v27  ;;  %3528 = vmatmul.msk.bf16.gmra.mxu1 %vm477_vm0, %v4389_v42  ;;  %v4428_v42 = vld [vmem:[%s5952_s3 + $0x28] sm:$0xff] }
  0x41   :  { %3501 = vmatmul.msk.bf16.gmra.mxu0 %vm477_vm0, %v4362_v7  ;;  %3537 = vmatmul.msk.bf16.gmra.mxu2 %vm477_vm0, %v4398_v16  ;;  %v4393_v16 = vld [vmem:[%s5950_s0 + $0x110] sm:$0xff] }
  0x42   :  { %3550 = vmatmul.msk.bf16.gmra.mxu3 %vm477_vm0, %v4411_v35  ;;  %3529 = vmatmul.msk.bf16.gmra.mxu1 %vm477_vm0, %v4390_v50  ;;  %v4426_v50 = vld [vmem:[%s5952_s3 + $0x18] sm:$0xff] }
  0x51   :  { %3502 = vmatmul.msk.bf16.gmra.mxu0 %vm477_vm0, %v4363_v8  ;;  %3538 = vmatmul.msk.bf16.gmra.mxu2 %vm477_vm0, %v4399_v22 }
  0x52   :  { %3551 = vmatmul.msk.bf16.gmra.mxu3 %vm477_vm0, %v4412_v43  ;;  %3530 = vmatmul.msk.bf16.gmra.mxu1 %vm477_vm0, %v4391_v59  ;;  %v4437_v59 = vld [vmem:[%s5952_s3 + $0x70] sm:$0xff] }
  0x61   :  { %3503 = vmatmul.msk.bf16.gmra.mxu0 %vm477_vm0, %v4364_v10  ;;  %3539 = vmatmul.msk.bf16.gmra.mxu2 %vm477_vm0, %v4400_v30  ;;  %v4417_v30 = vld [vmem:[%s5950_s0 + $0x1d0] sm:$0xff] }
  0x62   :  { %3552 = vmatmul.msk.bf16.gmra.mxu3 %vm477_vm0, %v4413_v51  ;;  %3531 = vmatmul.msk.bf16.gmra.mxu1 %vm477_vm0, %v4392_v5  ;;  %v4438_v51 = vld [vmem:[%s5952_s3 + $0x78] sm:$0xff] }
  0x63   :  { %2924 = vmatpush.bf16.msrb.mxu2 %v4438_v51 }
  0x67   :  { %2925 = vmatpush.bf16.msrb.mxu2 %v4437_v59  ;;  %v4454_v59 = vld [vmem:[%s5952_s3 + $0xf8] sm:$0xff] }
  0x71   :  { %3504 = vmatmul.msk.bf16.gmra.mxu0 %vm477_vm0, %v4365_v12  ;;  %3540 = vmatmul.msk.bf16.gmra.mxu2 %vm477_vm0, %v4401_v38  ;;  %v4374_v12 = vld [vmem:[%s5950_s0 + $0x78] sm:$0xff]  ;;  %v4429_v38 = vld [vmem:[%s5952_s3 + $0x30] sm:$0xff] }
  0x72   :  { %3553 = vmatmul.msk.bf16.gmra.mxu3 %vm477_vm0, %v4414_v60  ;;  %3532 = vmatmul.msk.bf16.gmra.mxu1 %vm477_vm0, %v4393_v16 }
  0x81   :  { %3505 = vmatmul.msk.bf16.gmra.mxu0 %vm477_vm0, %v4366_v14  ;;  %3541 = vmatmul.msk.bf16.gmra.mxu2 %vm477_vm0, %v4402_v46  ;;  %v4418_v46 = vld [vmem:[%s5950_s0 + $0x1d8] sm:$0xff] }
  0x82   :  { %3554 = vmatmul.msk.bf16.gmra.mxu3 %vm477_vm0, %v4415_v6 }
  0x8e   :  { %v670_v18 = vpop.f32.mrf.mxu0 }
  0x91   :  { %3506 = vmatmul.msk.bf16.gmra.mxu0 %vm477_vm0, %v4367_v17  ;;  %3542 = vmatmul.msk.bf16.gmra.mxu2 %vm477_vm0, %v4403_v54  ;;  %v4416_v17 = vld [vmem:[%s5950_s0 + $0x1c8] sm:$0xff] }
  0x92   :  { %3555 = vmatmul.msk.bf16.gmra.mxu3 %vm477_vm0, %v4416_v17 }
  0x94   :  { %v4821_v58 = vpop.f32.mrf.mxu2 }
  0x95   :  { %v4885_v19 = vpop.f32.mrf.mxu3 }
  0x96   :  { %v672_v20 = vpop.f32.mrf.mxu0 }
  0x97   :  { %v974_v21 = vmax.f32 %v670_v18, %v672_v20 }
  0x9c   :  { %v4833_v63 = vpop.f32.mrf.mxu2 }
  0x9d   :  { %v4900_v26 = vpop.f32.mrf.mxu3 }
  0x9e   :  { %v675_v24 = vpop.f32.mrf.mxu0 }
  0x9f   :  { %v4747_v25 = vmax.f32 %v974_v21, %v675_v24 }
  0xa1   :  { %3507 = vmatmul.msk.bf16.gmra.mxu0 %vm477_vm0, %v4368_v23  ;;  %3543 = vmatmul.msk.bf16.gmra.mxu2 %vm477_vm0, %v4404_v0  ;;  %v4406_v23 = vld [vmem:[%s5950_s0 + $0x178] sm:$0xff]  ;;  %v4436_v0 = vld [vmem:[%s5952_s3 + $0x68] sm:$0xff] }
  0xa2   :  { %3556 = vmatmul.msk.bf16.gmra.mxu3 %vm477_vm0, %v4417_v30  ;;  %2926 = vmatpush.bf16.msrb.mxu2 %v4436_v0  ;;  %v4433_v30 = vld [vmem:[%s5952_s3 + $0x50] sm:$0xff] }
  0xa3   :  { %v4441_v0 = vld [vmem:[%s5952_s3 + $0x90] sm:$0xff] }
  0xa4   :  { %v4844_v4 = vpop.f32.mrf.mxu2 }
  0xa6   :  { %v677_v28 = vpop.f32.mrf.mxu0 }
  0xa7   :  { %v982_v29 = vmax.f32 %v675_v24, %v677_v28  ;;  %v4375_v24 = vld [vmem:[%s5950_s0 + $0x80] sm:$0xff] }
  0xac   :  { %v4861_v10 = vpop.f32.mrf.mxu2 }
  0xae   :  { %v680_v32 = vpop.f32.mrf.mxu0 }
  0xaf   :  { %v4765_v33 = vmax.f32 %v982_v29, %v680_v32  ;;  %v4394_v29 = vld [vmem:[%s5950_s0 + $0x118] sm:$0xff] }
  0xb0   :  { %3533 = vmatmul.msk.bf16.gmra.mxu1 %vm477_vm0, %v4394_v29 }
  0xb1   :  { %3508 = vmatmul.msk.bf16.gmra.mxu0 %vm477_vm0, %v4369_v31  ;;  %3544 = vmatmul.msk.bf16.gmra.mxu2 %vm477_vm0, %v4405_v11 }
  0xb2   :  { %3557 = vmatmul.msk.bf16.gmra.mxu3 %vm477_vm0, %v4418_v46 }
  0xb4   :  { %v4872_v15 = vpop.f32.mrf.mxu2 }
  0xb6   :  { %v682_v36 = vpop.f32.mrf.mxu0 }
  0xb7   :  { %v990_v37 = vmax.f32 %v680_v32, %v682_v36  ;;  %v4917_v32 = vpop.f32.mrf.mxu3 }
  0xbc   :  { %v4891_v22 = vpop.f32.mrf.mxu2 }
  0xbe   :  { %v685_v40 = vpop.f32.mrf.mxu0 }
  0xbf   :  { %v4783_v41 = vmax.f32 %v990_v37, %v685_v40  ;;  %v4407_v37 = vld [vmem:[%s5950_s0 + $0x180] sm:$0xff] }
  0xc1   :  { %3509 = vmatmul.msk.bf16.gmra.mxu0 %vm477_vm0, %v4370_v39  ;;  %3545 = vmatmul.msk.bf16.gmra.mxu2 %vm477_vm0, %v4406_v23  ;;  %v4376_v39 = vld [vmem:[%s5950_s0 + $0x88] sm:$0xff]  ;;  %v4446_v23 = vld [vmem:[%s5952_s3 + $0xb8] sm:$0xff] }
  0xc2   :  { %2937 = vmatpush.bf16.msrb.mxu3 %v4446_v23 }
  0xc4   :  { %v4904_v28 = vpop.f32.mrf.mxu2 }
  0xc6   :  { %v687_v44 = vpop.f32.mrf.mxu0 }
  0xc7   :  { %v998_v45 = vmax.f32 %v685_v40, %v687_v44  ;;  %v4945_v44 = vpop.f32.mrf.mxu1 }
  0xc8   :  { %5962 = vst [vmem:[#allocation3_spill] sm:$0xff] %v4945_v44 }
  0xcc   :  { %v4926_v36 = vpop.f32.mrf.mxu2 }
  0xcd   :  { %5961 = vst [vmem:[#allocation2_spill] sm:$0xff] %v4926_v36 }
  0xce   :  { %v690_v48 = vpop.f32.mrf.mxu0 }
  0xcf   :  { %v4801_v49 = vmax.f32 %v998_v45, %v690_v48  ;;  %v4971_v54 = vpop.f32.mrf.mxu1 }
  0xd1   :  { %3510 = vmatmul.msk.bf16.gmra.mxu0 %vm477_vm0, %v4371_v47  ;;  %3546 = vmatmul.msk.bf16.gmra.mxu2 %vm477_vm0, %v4407_v37  ;;  %v4427_v47 = vld [vmem:[%s5952_s3 + $0x20] sm:$0xff] }
  0xd4   :  { %v4947_v45 = vpop.f32.mrf.mxu2 }
  0xd5   :  { %5963 = vst [vmem:[#allocation4_spill] sm:$0xff] %v4947_v45 }
  0xd6   :  { %v692_v52 = vpop.f32.mrf.mxu0 }
  0xd7   :  { %v1006_v53 = vmax.f32 %v690_v48, %v692_v52  ;;  %v4997_v5 = vpop.f32.mrf.mxu1 }
  0xde   :  { %v695_v56 = vpop.f32.mrf.mxu0 }
  0xdf   :  { %v4819_v57 = vmax.f32 %v1006_v53, %v695_v56  ;;  %v4425_v56 = vld [vmem:[%s5952_s3 + $0x10] sm:$0xff] }
  0xe1   :  { %3511 = vmatmul.msk.bf16.gmra.mxu0 %vm477_vm0, %v4372_v55  ;;  %v4973_v55 = vpop.f32.mrf.mxu2 }
  0xe6   :  { %v697_v61 = vpop.f32.mrf.mxu0 }
  0xe7   :  { %v976_v62 = vmax.f32 %v4747_v25, %v697_v61 }
  0xe9   :  { %v4999_v6 = vpop.f32.mrf.mxu2 }
  0xee   :  { %v700_v2 = vpop.f32.mrf.mxu0 }
  0xef   :  { %v4842_v3 = vmax.f32 %v976_v62, %v700_v2  ;;  %v4424_v62 = vld [vmem:[%s5952_s3 + $0x8] sm:$0xff] }
  0xf1   :  { %3512 = vmatmul.msk.bf16.gmra.mxu0 %vm477_vm0, %v4373_v1  ;;  %v141_v1 = vld [vmem:[%s5950_s0 + $0x1e0] sm:$0xf]  ;;  %v5023_v29 = vpop.f32.mrf.mxu2 }
  0xf6   :  { %v4855_v7 = vpop.f32.mrf.mxu0 }
  0xf7   :  { %v978_v8 = vmax.f32 %v4842_v3, %v4855_v7  ;;  %v984_v9 = vmax.f32 %v4765_v33, %v4855_v7  ;;  %v4430_v33 = vld [vmem:[%s5952_s3 + $0x38] sm:$0xff]  ;;  %v4452_v3 = vld [vmem:[%s5952_s3 + $0xe8] sm:$0xff] }
  0xf8   :  { %2911 = vmatpush.bf16.msrb.mxu1 %v4430_v33  ;;  %v4445_v33 = vld [vmem:[%s5952_s3 + $0xb0] sm:$0xff] }
  0xf9   :  { %2938 = vmatpush.bf16.msrb.mxu3 %v4445_v33  ;;  %v5044_v46 = vpop.f32.mrf.mxu2  ;;  %v4440_v33 = vld [vmem:[%s5952_s3 + $0x88] sm:$0xff] }
  0xfc   :  { %2912 = vmatpush.bf16.msrb.mxu1 %v4429_v38 }
  0xfe   :  { %v705_v13 = vpop.f32.mrf.mxu0 }
  0xff   :  { %v4870_v14 = vmax.f32 %v984_v9, %v705_v13  ;;  %v391_v9 = vunpack.c.l.b16 %v141_v1  ;;  %v4435_v13 = vld [vmem:[%s5952_s3 + $0x60] sm:$0xff]  ;;  %v4453_v1 = vld [vmem:[%s5952_s3 + $0xf0] sm:$0xff] }
 0x100   :  { %2913 = vmatpush.bf16.msrb.mxu1 %v4428_v42  ;;  %2927 = vmatpush.bf16.msrb.mxu2 %v4435_v13  ;;  %v4379_v13 = vld [vmem:[%s5950_s0 + $0xa0] sm:$0xff] }
 0x101   :  { %3513 = vmatmul.msk.bf16.gmra.mxu0 %vm477_vm0, %v4374_v12  ;;  %v452_v11 = vpack.c.b16 %v391_v9, %v391_v9  ;;  %v4423_v12 = vld [vmem:[%s5952_s3] sm:$0xff] }
 0x102   :  { %v5074_v9 = vld [vmem:[%s5951_s2] sm:$0xff] }
 0x103   :  { %3558 = vmatmul.msk.bf16.gmra.mxu3 %vm477_vm0, %v452_v11 }
 0x104   :  { %2914 = vmatpush.bf16.msrb.mxu1 %v4427_v47  ;;  %v4431_v47 = vld [vmem:[%s5952_s3 + $0x40] sm:$0xff] }
 0x106   :  { %v4883_v18 = vpop.f32.mrf.mxu0 }
 0x107   :  { %v986_v20 = vmax.f32 %v4870_v14, %v4883_v18  ;;  %v992_v21 = vmax.f32 %v4783_v41, %v4883_v18  ;;  %v4938_v41 = vpop.f32.mrf.mxu3  ;;  %v4460_v14 = vld [vmem:[%s5952_s3 + $0x128] sm:$0xff] }
 0x108   :  { %2915 = vmatpush.bf16.msrb.mxu1 %v4426_v50  ;;  %v4443_v50 = vld [vmem:[%s5952_s3 + $0xa0] sm:$0xff] }
 0x10c   :  { %2916 = vmatpush.bf16.msrb.mxu1 %v4425_v56  ;;  %v4442_v56 = vld [vmem:[%s5952_s3 + $0x98] sm:$0xff] }
 0x10e   :  { %v710_v25 = vpop.f32.mrf.mxu0 }
 0x10f   :  { %v4902_v27 = vmax.f32 %v992_v21, %v710_v25  ;;  %v4434_v21 = vld [vmem:[%s5952_s3 + $0x58] sm:$0xff]  ;;  %v5021_v25 = vpop.f32.mrf.mxu1 }
 0x110   :  { %2917 = vmatpush.bf16.msrb.mxu1 %v4424_v62  ;;  %2928 = vmatpush.bf16.msrb.mxu2 %v4434_v21  ;;  %v5063_v62 = vpop.f32.mrf.mxu2  ;;  %v1182_v21 = vperm.slane %v5074_v9, 0 }
 0x111   :  { %3514 = vmatmul.msk.bf16.gmra.mxu0 %vm477_vm0, %v4375_v24 }
 0x114   :  { %2918 = vmatpush.bf16.msrb.mxu1 %v4423_v12  ;;  %2929 = vmatpush.bf16.msrb.mxu2 %v4433_v30 }
 0x116   :  { %v4915_v31 = vpop.f32.mrf.mxu0 }
 0x117   :  { %v994_v34 = vmax.f32 %v4902_v27, %v4915_v31  ;;  %v1000_v35 = vmax.f32 %v4801_v49, %v4915_v31  ;;  %v4959_v49 = vpop.f32.mrf.mxu3  ;;  %v5042_v42 = vpop.f32.mrf.mxu1 }
 0x118   :  { %2950 = vmatpush.bf16.msra.mxu1 %v4454_v59 }
 0x11c   :  { %2951 = vmatpush.bf16.msra.mxu1 %v4453_v1 }
 0x11e   :  { %v715_v40 = vpop.f32.mrf.mxu0 }
 0x11f   :  { %v4943_v43 = vmax.f32 %v1000_v35, %v715_v40  ;;  %v4984_v61 = vpop.f32.mrf.mxu3  ;;  %v4378_v35 = vld [vmem:[%s5950_s0 + $0x98] sm:$0xff]  ;;  %v4444_v40 = vld [vmem:[%s5952_s3 + $0xa8] sm:$0xff] }
 0x120   :  { %2939 = vmatpush.bf16.msrb.mxu3 %v4444_v40  ;;  %2952 = vmatpush.bf16.msra.mxu1 %v4452_v3  ;;  %v4439_v40 = vld [vmem:[%s5952_s3 + $0x80] sm:$0xff] }
 0x121   :  { %3515 = vmatmul.msk.bf16.gmra.mxu0 %vm477_vm0, %v4376_v39  ;;  %v4432_v39 = vld [vmem:[%s5952_s3 + $0x48] sm:$0xff] }
 0x122   :  { %2930 = vmatpush.bf16.msrb.mxu2 %v4432_v39 }
 0x124   :  { %2940 = vmatpush.bf16.msrb.mxu3 %v4443_v50 }
 0x126   :  { %v4957_v48 = vpop.f32.mrf.mxu0  ;;  %2931 = vmatpush.bf16.msrb.mxu2 %v4431_v47  ;;  %v4451_v47 = vld [vmem:[%s5952_s3 + $0xe0] sm:$0xff] }
 0x127   :  { %v1008_v53 = vmax.f32 %v4819_v57, %v4957_v48  ;;  %v4377_v57 = vld [vmem:[%s5950_s0 + $0x90] sm:$0xff]  ;;  %v5011_v17 = vpop.f32.mrf.mxu3  ;;  %2953 = vmatpush.bf16.msra.mxu1 %v4451_v47 }
 0x128   :  { %2941 = vmatpush.bf16.msrb.mxu3 %v4442_v56 }
 0x12c   :  { %2942 = vmatpush.bf16.msrb.mxu3 %v4441_v0  ;;  %v4462_v0 = vld [vmem:[%s5952_s3 + $0x138] sm:$0xff] }
 0x12d   :  { %2963 = vmatpush.bf16.msra.mxu2 %v4462_v0  ;;  %v4459_v0 = vld [vmem:[%s5952_s3 + $0x120] sm:$0xff] }
 0x12e   :  { %v720_v60 = vpop.f32.mrf.mxu0 }
 0x12f   :  { %v4995_v2 = vmax.f32 %v1008_v53, %v720_v60  ;;  %v5034_v38 = vpop.f32.mrf.mxu3  ;;  %v5061_v60 = vpop.f32.mrf.mxu1 }
 0x130   :  { %2943 = vmatpush.bf16.msrb.mxu3 %v4440_v33 }
 0x131   :  { %3516 = vmatmul.msk.bf16.gmra.mxu0 %vm477_vm0, %v4377_v57 }
 0x134   :  { %2944 = vmatpush.bf16.msrb.mxu3 %v4439_v40 }
 0x136   :  { %v5009_v16 = vpop.f32.mrf.mxu0 }
 0x137   :  { %v5053_v53 = vpop.f32.mrf.mxu3 }
 0x13e   :  { %v725_v37 = vpop.f32.mrf.mxu0 }
 0x13f   :  { %v979_v11 = vmax.f32 %v978_v8, %v725_v37  ;;  %v5083_v30 = vpop.f32.mrf.mxu3  ;;  %v5091_v8 = vpop.f32.mrf.mxu1 }
 0x140   :  { %5964 = vst [vmem:[#allocation5_spill] sm:$0xff] %v5091_v8 }
 0x141   :  { %3517 = vmatmul.msk.bf16.gmra.mxu0 %vm477_vm0, %v4378_v35 }
 0x146   :  { %v727_v51 = vpop.f32.mrf.mxu0 }
 0x147   :  { %v1014_v57 = vmax.f32 %v725_v37, %v727_v51  ;;  %v980_v12 = vmax.f32 %v979_v11, %v727_v51  ;;  %v5095_v37 = vpop.f32.mrf.mxu2  ;;  %v5104_v59 = vpop.f32.mrf.mxu3 }
 0x148   :  { %v5112_v11 = vpop.f32.mrf.mxu1 }
 0x14e   :  { %v730_v23 = vpop.f32.mrf.mxu0 }
 0x14f   :  { %v981_v7 = vmax.f32 %v980_v12, %v730_v23  ;;  %v5093_v35 = vmax.f32 %v1014_v57, %v730_v23  ;;  %v4450_v57 = vld [vmem:[%s5952_s3 + $0xd8] sm:$0xff]  ;;  %v5114_v12 = vpop.f32.mrf.mxu2  ;;  %v987_v33 = vmax.f32 %v986_v20, %v730_v23  ;;  %v5129_v47 = vpop.f32.mrf.mxu3 }
 0x150   :  { %2954 = vmatpush.bf16.msra.mxu1 %v4450_v57  ;;  %v5137_v20 = vpop.f32.mrf.mxu1  ;;  %v4447_v57 = vld [vmem:[%s5952_s3 + $0xc0] sm:$0xff] }
 0x151   :  { %3518 = vmatmul.msk.bf16.gmra.mxu0 %vm477_vm0, %v4379_v13  ;;  %v1232_v39 = vadd.f32 %v1182_v21, %v981_v7  ;;  %v4449_v13 = vld [vmem:[%s5952_s3 + $0xd0] sm:$0xff]  ;;  %v1183_v7 = vperm.slane %v5074_v9, 1 }
 0x152   :  { %v4461_v21 = vld [vmem:[%s5952_s3 + $0x130] sm:$0xff] }
 0x153   :  { %v1257_v50 = vmax.f32 %v1232_v39, 0.0  ;;  %2964 = vmatpush.bf16.msra.mxu2 %v4461_v21  ;;  %v4380_v39 = vld [vmem:[%s5950_s0 + $0xa8] sm:$0xff] }
 0x154   :  { %2955 = vmatpush.bf16.msra.mxu1 %v4449_v13 }
 0x155   :  { %v1282_v51 = vpack.c.bf16 %v1257_v50, %v1257_v50  ;;  %v4448_v50 = vld [vmem:[%s5952_s3 + $0xc8] sm:$0xff] }
 0x156   :  { %v732_v56 = vpop.f32.mrf.mxu0 }
 0x157   :  { %v1022_v1 = vmax.f32 %v730_v23, %v732_v56  ;;  %2919 = vmatmul.bf16.vlgmr.msrb.gmra.mxu1 %v1282_v51  ;;  %v988_v3 = vmax.f32 %v987_v33, %v732_v56  ;;  %v5141_v51 = vpop.f32.mrf.mxu2  ;;  %2965 = vmatpush.bf16.msra.mxu2 %v4460_v14  ;;  %v945_v33 = vpop.f32.mrf.mxu3  ;;  %v4457_v14 = vld [vmem:[%s5952_s3 + $0x110] sm:$0xff] }
 0x158   :  { %5965 = vst [vmem:[#allocation6_spill] sm:$0xff] %v5141_v51  ;;  %2956 = vmatpush.bf16.msra.mxu1 %v4448_v50 }
 0x15b   :  { %2966 = vmatpush.bf16.msra.mxu2 %v4459_v0  ;;  %v4381_v0 = vld [vmem:[%s5950_s0 + $0xb0] sm:$0xff] }
 0x15c   :  { %2957 = vmatpush.bf16.msra.mxu1 %v4447_v57  ;;  %v1184_v57 = vperm.slane %v5074_v9, 2 }
 0x15e   :  { %v735_v40 = vpop.f32.mrf.mxu0 }
 0x15f   :  { %v989_v18 = vmax.f32 %v988_v3, %v735_v40  ;;  %v5139_v23 = vmax.f32 %v1022_v1, %v735_v40  ;;  %v4458_v3 = vld [vmem:[%s5952_s3 + $0x118] sm:$0xff]  ;;  %v5155_v50 = vpop.f32.mrf.mxu2 }
 0x160   :  { %5966 = vst [vmem:[#allocation7_spill] sm:$0xff] %v5155_v50  ;;  %2967 = vmatpush.bf16.msra.mxu2 %v4458_v3  ;;  %v4456_v3 = vld [vmem:[%s5952_s3 + $0x108] sm:$0xff] }
 0x161   :  { %v1233_v56 = vadd.f32 %v1183_v7, %v989_v18  ;;  %3519 = vmatmul.msk.bf16.gmra.mxu0 %vm477_vm0, %v4380_v39  ;;  %v5153_v39 = vpop.f32.mrf.mxu1  ;;  %v995_v18 = vmax.f32 %v994_v34, %v735_v40  ;;  %v1134_v34 = vmax.f32 %v5141_v51, %v5155_v50  ;;  %v5969_v50 = vmax.f32 %v4943_v43, %v4957_v48 }
 0x163   :  { %v1258_v13 = vmax.f32 %v1233_v56, 0.0 }
 0x164   :  { %2968 = vmatpush.bf16.msra.mxu2 %v4457_v14 }
 0x165   :  { %v1283_v1 = vpack.c.bf16 %v1258_v13, %v1258_v13 }
 0x166   :  { %v737_v21 = vpop.f32.mrf.mxu0 }
 0x167   :  { %v1030_v7 = vmax.f32 %v735_v40, %v737_v21  ;;  %2932 = vmatmul.bf16.vlgmr.msrb.gmra.mxu2 %v1283_v1  ;;  %v996_v56 = vmax.f32 %v995_v18, %v737_v21  ;;  %v947_v1 = vpop.f32.mrf.mxu3  ;;  %v5174_v27 = vpop.f32.mrf.mxu2  ;;  %v4455_v40 = vld [vmem:[%s5952_s3 + $0x100] sm:$0xff] }
 0x168   :  { %5967 = vst [vmem:[#allocation8_spill] sm:$0xff] %v5174_v27  ;;  %2969 = vmatpush.bf16.msra.mxu2 %v4456_v3  ;;  %v1135_v18 = vmax.f32 %v1134_v34, %v5174_v27  ;;  %v1185_v34 = vperm.slane %v5074_v9, 3 }
 0x169   :  { %v5170_v52 = vpop.f32.mrf.mxu1 }
 0x16c   :  { %2970 = vmatpush.bf16.msra.mxu2 %v4455_v40 }
 0x16e   :  { %v740_v13 = vpop.f32.mrf.mxu0 }
 0x16f   :  { %v997_v24 = vmax.f32 %v996_v56, %v740_v13  ;;  %v5172_v45 = vmax.f32 %v1030_v7, %v740_v13  ;;  %v950_v56 = vpop.f32.mrf.mxu3 }
 0x171   :  { %v1234_v31 = vadd.f32 %v1184_v57, %v997_v24  ;;  %3520 = vmatmul.msk.bf16.gmra.mxu0 %vm477_vm0, %v4381_v0  ;;  %v1136_v24 = vmax.f32 %v1135_v18, %v4900_v26  ;;  %v5184_v57 = vpop.f32.mrf.mxu1  ;;  %v5186_v0 = vpop.f32.mrf.mxu2 }
 0x172   :  { %5968 = vst [vmem:[#allocation9_spill] sm:$0xff] %v5186_v0  ;;  %v1142_v18 = vmax.f32 %v5174_v27, %v5186_v0 }
 0x173   :  { %v1259_v21 = vmax.f32 %v1234_v31, 0.0  ;;  %v1137_v3 = vmax.f32 %v1136_v24, %v4917_v32  ;;  %v1003_v31 = vmax.f32 %v5969_v50, %v740_v13 }
 0x175   :  { %v1284_v14 = vpack.c.bf16 %v1259_v21, %v1259_v21  ;;  %v1138_v40 = vmax.f32 %v1137_v3, %v4938_v41 }
 0x176   :  { %v742_v7 = vpop.f32.mrf.mxu0 }
 0x177   :  { %v1038_v36 = vmax.f32 %v740_v13, %v742_v7  ;;  %2945 = vmatmul.bf16.vlgmr.msrb.gmra.mxu3 %v1284_v14  ;;  %v1004_v21 = vmax.f32 %v1003_v31, %v742_v7  ;;  %v4382_v14 = vld [vmem:[%s5950_s0 + $0xb8] sm:$0xff]  ;;  %v1139_v26 = vmax.f32 %v1138_v40, %v945_v33  ;;  %v952_v8 = vpop.f32.mrf.mxu3  ;;  %v1118_v7 = vmax.f32 %v4821_v58, %v4833_v63 }
 0x179   :  { %v1140_v24 = vmax.f32 %v1139_v26, %v947_v1  ;;  %v5199_v44 = vpop.f32.mrf.mxu1  ;;  %v5203_v48 = vpop.f32.mrf.mxu2 }
 0x17a   :  { %v1143_v33 = vmax.f32 %v1142_v18, %v5203_v48 }
 0x17b   :  { %v5206_v13 = vmax.f32 %v1140_v24, %v950_v56 }
 0x17c   :  { %v1144_v31 = vmax.f32 %v1143_v33, %v4938_v41  ;;  %v5971_v41 = vmax.f32 %v4995_v2, %v5009_v16 }
 0x17d   :  { %5970 = vst [vmem:[#allocation10_spill] sm:$0xff] %v5206_v13 }
 0x17e   :  { %v745_v51 = vpop.f32.mrf.mxu0 }
 0x17f   :  { %v1005_v32 = vmax.f32 %v1004_v21, %v745_v51  ;;  %v5201_v43 = vmax.f32 %v1038_v36, %v745_v51  ;;  %v955_v21 = vpop.f32.mrf.mxu3  ;;  %v1119_v36 = vmax.f32 %v1118_v7, %v4844_v4  ;;  %v1186_v7 = vperm.slane %v5074_v9, 4 }
 0x181   :  { %v1235_v50 = vadd.f32 %v1185_v34, %v1005_v32  ;;  %3521 = vmatmul.msk.bf16.gmra.mxu0 %vm477_vm0, %v4382_v14  ;;  %v1145_v34 = vmax.f32 %v1144_v31, %v4959_v49  ;;  %v5214_v14 = vpop.f32.mrf.mxu1  ;;  %v5216_v32 = vpop.f32.mrf.mxu2  ;;  %v1120_v24 = vmax.f32 %v1119_v36, %v5023_v29  ;;  %v4383_v49 = vld [vmem:[%s5950_s0 + $0xc0] sm:$0xff] }
 0x183   :  { %v1260_v3 = vmax.f32 %v1235_v50, 0.0  ;;  %v1146_v18 = vmax.f32 %v1145_v34, %v4984_v61  ;;  %v1011_v50 = vmax.f32 %v5971_v41, %v745_v51  ;;  %v1121_v36 = vmax.f32 %v1120_v24, %v5044_v46 }
 0x184   :  { %v1126_v46 = vmax.f32 %v4844_v4, %v4861_v10 }
 0x185   :  { %v1285_v1 = vpack.c.bf16 %v1260_v3, %v1260_v3  ;;  %v1147_v33 = vmax.f32 %v1146_v18, %v950_v56 }
 0x186   :  { %v747_v40 = vpop.f32.mrf.mxu0 }
 0x187   :  { %v1046_v26 = vmax.f32 %v745_v51, %v747_v40  ;;  %2958 = vmatmul.bf16.vlgmr.msra.gmra.mxu1 %v1285_v1  ;;  %v1012_v3 = vmax.f32 %v1011_v50, %v747_v40  ;;  %v1148_v31 = vmax.f32 %v1147_v33, %v952_v8  ;;  %v1150_v1 = vmax.f32 %v5203_v48, %v5216_v32  ;;  %v957_v34 = vpop.f32.mrf.mxu3 }
 0x188   :  { %v1122_v8 = vmax.f32 %v1121_v36, %v5063_v62 }
 0x189   :  { %v5232_v2 = vmax.f32 %v1148_v31, %v955_v21  ;;  %v5234_v16 = vpop.f32.mrf.mxu1  ;;  %v905_v51 = vpop.f32.mrf.mxu2 }
 0x18a   :  { %v1151_v40 = vmax.f32 %v1150_v1, %v905_v51 }
 0x18c   :  { %v1152_v41 = vmax.f32 %v1151_v40, %v4984_v61 }
 0x18e   :  { %v750_v13 = vpop.f32.mrf.mxu0  ;;  %v1153_v33 = vmax.f32 %v1152_v41, %v5011_v17  ;;  %v5254_v17 = vld [vmem:[%s5951_s2 + $0x10] sm:$0xff] }
 0x18f   :  { %v1013_v0 = vmax.f32 %v1012_v3, %v750_v13  ;;  %v5230_v27 = vmax.f32 %v1046_v26, %v750_v13  ;;  %v960_v26 = vpop.f32.mrf.mxu3  ;;  %v1123_v3 = vmax.f32 %v1122_v8, %v905_v51 }
 0x190   :  { %v1154_v31 = vmax.f32 %v1153_v33, %v5034_v38 }
 0x191   :  { %v1236_v56 = vadd.f32 %v1186_v7, %v1013_v0  ;;  %3522 = vmatmul.msk.bf16.gmra.mxu0 %vm477_vm0, %v4383_v49  ;;  %v5243_v0 = vpop.f32.mrf.mxu1  ;;  %v1127_v7 = vmax.f32 %v1126_v46, %v4872_v15  ;;  %v907_v61 = vpop.f32.mrf.mxu2  ;;  %v1204_v46 = vperm.slane %v5254_v17, 6 }
 0x192   :  { %v1110_v49 = vmax.f32 %v5234_v16, %v5243_v0  ;;  %v1124_v1 = vmax.f32 %v1123_v3, %v907_v61  ;;  %v1158_v36 = vmax.f32 %v905_v51, %v907_v61  ;;  %v1155_v40 = vmax.f32 %v1154_v31, %v955_v21 }
 0x193   :  { %v1261_v18 = vmax.f32 %v1236_v56, 0.0 }
 0x194   :  { %v1111_v56 = vmax.f32 %v1110_v49, %v4821_v58  ;;  %v1156_v41 = vmax.f32 %v1155_v40, %v957_v34 }
 0x195   :  { %v1286_v24 = vpack.c.bf16 %v1261_v18, %v1261_v18  ;;  %v4384_v18 = vld [vmem:[%s5950_s0 + $0xc8] sm:$0xff] }
 0x196   :  { %v752_v13 = vpop.f32.mrf.mxu0  ;;  %v1112_v8 = vmax.f32 %v1111_v56, %v4973_v55 }
 0x197   :  { %v1016_v50 = vmax.f32 %v5093_v35, %v752_v13  ;;  %2971 = vmatmul.bf16.vlgmr.msra.gmra.mxu2 %v1286_v24  ;;  %v1128_v35 = vmax.f32 %v1127_v7, %v5063_v62  ;;  %v962_v21 = vpop.f32.mrf.mxu3  ;;  %v1157_v62 = vmax.f32 %v1156_v41, %v960_v26 }
 0x198   :  { %v1113_v13 = vmax.f32 %v1112_v8, %v4999_v6 }
 0x199   :  { %v1129_v3 = vmax.f32 %v1128_v35, %v5095_v37  ;;  %v910_v49 = vpop.f32.mrf.mxu2  ;;  %v5267_v61 = vadd.f32 %v1204_v46, %v1157_v62 }
 0x19a   :  { %v1114_v7 = vmax.f32 %v1113_v13, %v5023_v29  ;;  %v5269_v31 = vmax.f32 %v1124_v1, %v910_v49  ;;  %v1159_v34 = vmax.f32 %v1158_v36, %v910_v49 }
 0x19c   :  { %v1115_v56 = vmax.f32 %v1114_v7, %v5203_v48  ;;  %v1160_v6 = vmax.f32 %v1159_v34, %v5034_v38 }
 0x19e   :  { %v755_v24 = vpop.f32.mrf.mxu0  ;;  %v1116_v40 = vmax.f32 %v1115_v56, %v5216_v32  ;;  %v1161_v1 = vmax.f32 %v1160_v6, %v5053_v53 }
 0x19f   :  { %v5262_v33 = vmax.f32 %v1016_v50, %v755_v24  ;;  %v1130_v50 = vmax.f32 %v1129_v3, %v5114_v12  ;;  %v965_v37 = vpop.f32.mrf.mxu3  ;;  %v4385_v24 = vld [vmem:[%s5950_s0 + $0xd0] sm:$0xff] }
 0x1a0   :  { %v5286_v38 = vmax.f32 %v1116_v40, %v905_v51  ;;  %v1162_v12 = vmax.f32 %v1161_v1, %v5083_v30  ;;  %v4469_v1 = vld [vmem:[%s5952_s3 + $0x170] sm:$0xff] }
 0x1a1   :  { %3523 = vmatmul.msk.bf16.gmra.mxu0 %vm477_vm0, %v4384_v18  ;;  %v5282_v36 = vpop.f32.mrf.mxu2  ;;  %v5284_v18 = vmax.f32 %v1130_v50, %v910_v49 }
 0x1a2   :  { %v1166_v32 = vmax.f32 %v910_v49, %v5282_v36  ;;  %v1163_v41 = vmax.f32 %v1162_v12, %v960_v26  ;;  %v4468_v12 = vld [vmem:[%s5952_s3 + $0x168] sm:$0xff] }
 0x1a4   :  { %v1167_v46 = vmax.f32 %v1166_v32, %v4885_v19 }
 0x1a6   :  { %v5275_v8 = vpop.f32.mrf.mxu0  ;;  %v1168_v53 = vmax.f32 %v1167_v46, %v5083_v30  ;;  %v4467_v46 = vld [vmem:[%s5952_s3 + $0x160] sm:$0xff] }
 0x1a7   :  { %v1018_v29 = vmax.f32 %v5262_v33, %v5275_v8  ;;  %v1024_v35 = vmax.f32 %v5139_v23, %v5275_v8  ;;  %v1164_v23 = vmax.f32 %v1163_v41, %v962_v21  ;;  %v967_v62 = vpop.f32.mrf.mxu3  ;;  %v4497_v8 = vld [vmem:[%s5952_s3 + $0x250] sm:$0xff] }
 0x1a8   :  { %v1169_v7 = vmax.f32 %v1168_v53, %v5104_v59  ;;  %v4386_v59 = vld [vmem:[%s5950_s0 + $0xd8] sm:$0xff] }
 0x1a9   :  { %v5297_v51 = vmax.f32 %v1164_v23, %v965_v37  ;;  %v4466_v23 = vld [vmem:[%s5952_s3 + $0x158] sm:$0xff] }
 0x1aa   :  { %v1170_v26 = vmax.f32 %v1169_v7, %v5129_v47  ;;  %v4470_v47 = vld [vmem:[%s5952_s3 + $0x178] sm:$0xff] }
 0x1ab   :  { %2976 = vmatpush.bf16.msra.mxu3 %v4470_v47  ;;  %v4478_v53 = vld [vmem:[%s5952_s3 + $0x1b8] sm:$0xff] }
 0x1ac   :  { %v1171_v49 = vmax.f32 %v1170_v26, %v965_v37  ;;  %2989 = vmatpush.bf16.msrb.mxu1 %v4478_v53  ;;  %v4494_v47 = vld [vmem:[%s5952_s3 + $0x238] sm:$0xff]  ;;  %v4485_v53 = vld [vmem:[%s5952_s3 + $0x1f0] sm:$0xff] }
 0x1ae   :  { %v760_v13 = vpop.f32.mrf.mxu0  ;;  %v1172_v34 = vmax.f32 %v1171_v49, %v967_v62  ;;  %v4477_v62 = vld [vmem:[%s5952_s3 + $0x1b0] sm:$0xff]  ;;  %v4464_v49 = vld [vmem:[%s5952_s3 + $0x148] sm:$0xff] }
 0x1af   :  { %v5295_v3 = vmax.f32 %v1024_v35, %v760_v13  ;;  %v970_v6 = vpop.f32.mrf.mxu3  ;;  %2977 = vmatpush.bf16.msra.mxu3 %v4469_v1 }
 0x1b0   :  { %v5308_v50 = vmax.f32 %v1172_v34, %v970_v6  ;;  %2990 = vmatpush.bf16.msrb.mxu1 %v4477_v62  ;;  %v4476_v34 = vld [vmem:[%s5952_s3 + $0x1a8] sm:$0xff] }
 0x1b1   :  { %3524 = vmatmul.msk.bf16.gmra.mxu0 %vm477_vm0, %v4385_v24 }
 0x1b3   :  { %2978 = vmatpush.bf16.msra.mxu3 %v4468_v12 }
 0x1b4   :  { %2991 = vmatpush.bf16.msrb.mxu1 %v4476_v34 }
 0x1b6   :  { %v5302_v56 = vpop.f32.mrf.mxu0 }
 0x1b7   :  { %v1026_v30 = vmax.f32 %v5295_v3, %v5302_v56  ;;  %v1032_v21 = vmax.f32 %v5172_v45, %v5302_v56  ;;  %v972_v37 = vpop.f32.mrf.mxu3  ;;  %2979 = vmatpush.bf16.msra.mxu3 %v4467_v46  ;;  %v4486_v46 = vld [vmem:[%s5952_s3 + $0x1f8] sm:$0xff]  ;;  %v4515_v3 = vld [vmem:[%s5952_s3 + $0x2e0] sm:$0xff] }
 0x1b8   :  { %3002 = vmatpush.bf16.msrb.mxu2 %v4486_v46 }
 0x1bb   :  { %2980 = vmatpush.bf16.msra.mxu3 %v4466_v23  ;;  %v4492_v23 = vld [vmem:[%s5952_s3 + $0x228] sm:$0xff] }
 0x1bc   :  { %3003 = vmatpush.bf16.msrb.mxu2 %v4485_v53  ;;  %v4482_v53 = vld [vmem:[%s5952_s3 + $0x1d8] sm:$0xff] }
 0x1be   :  { %v765_v40 = vpop.f32.mrf.mxu0 }
 0x1bf   :  { %v5316_v35 = vmax.f32 %v1032_v21, %v765_v40  ;;  %v4475_v40 = vld [vmem:[%s5952_s3 + $0x1a0] sm:$0xff] }
 0x1c0   :  { %2992 = vmatpush.bf16.msrb.mxu1 %v4475_v40 }
 0x1c1   :  { %3525 = vmatmul.msk.bf16.gmra.mxu0 %vm477_vm0, %v4386_v59  ;;  %v4463_v59 = vld [vmem:[%s5952_s3 + $0x140] sm:$0xff] }
 0x1c6   :  { %v5322_v45 = vpop.f32.mrf.mxu0 }
 0x1c7   :  { %v1034_v32 = vmax.f32 %v5316_v35, %v5322_v45  ;;  %v1040_v41 = vmax.f32 %v5201_v43, %v5322_v45  ;;  %v4465_v43 = vld [vmem:[%s5952_s3 + $0x150] sm:$0xff] }
 0x1c8   :  { %2981 = vmatpush.bf16.msra.mxu3 %v4465_v43  ;;  %v4635_v43 = vld [vmem:[%s5953_s4] ss:$0 sm:$0xff] }
 0x1cc   :  { %2982 = vmatpush.bf16.msra.mxu3 %v4464_v49  ;;  %v4472_v49 = vld [vmem:[%s5952_s3 + $0x188] sm:$0xff] }
 0x1ce   :  { %v770_v24 = vpop.f32.mrf.mxu0 }
 0x1cf   :  { %v5340_v13 = vmax.f32 %v1040_v41, %v770_v24  ;;  %v4493_v41 = vld [vmem:[%s5952_s3 + $0x230] sm:$0xff] }
 0x1d0   :  { %2983 = vmatpush.bf16.msra.mxu3 %v4463_v59  ;;  %v4473_v24 = vld [vmem:[%s5952_s3 + $0x190] sm:$0xff]  ;;  %v4484_v59 = vld [vmem:[%s5952_s3 + $0x1e8] sm:$0xff] }
 0x1d1   :  { %3004 = vmatpush.bf16.msrb.mxu2 %v4484_v59  ;;  %v4481_v59 = vld [vmem:[%s5952_s3 + $0x1d0] sm:$0xff] }
 0x1d4   :  { %v2920_v7 = vpop.f32.mrf.mxu1  ;;  %3015 = vmatpush.bf16.msrb.mxu3 %v4494_v47 }
 0x1d5   :  { %v2921_v40 = vadd.f32 %v4635_v43, %v2920_v7  ;;  %v4483_v7 = vld [vmem:[%s5952_s3 + $0x1e0] sm:$0xff] }
 0x1d6   :  { %v5348_v26 = vpop.f32.mrf.mxu0  ;;  %3005 = vmatpush.bf16.msrb.mxu2 %v4483_v7 }
 0x1d7   :  { %v1042_v6 = vmax.f32 %v5340_v13, %v5348_v26  ;;  %v1048_v21 = vmax.f32 %v5230_v27, %v5348_v26  ;;  %v4474_v27 = vld [vmem:[%s5952_s3 + $0x198] sm:$0xff] }
 0x1d8   :  { %2993 = vmatpush.bf16.msrb.mxu1 %v4474_v27  ;;  %3016 = vmatpush.bf16.msrb.mxu3 %v4493_v41  ;;  %v4490_v27 = vld [vmem:[%s5952_s3 + $0x218] sm:$0xff] }
 0x1d9   :  { %v4502_v41 = vld [vmem:[%s5952_s3 + $0x278] sm:$0xff] }
 0x1da   :  { %3006 = vmatpush.bf16.msrb.mxu2 %v4482_v53  ;;  %v4498_v53 = vld [vmem:[%s5952_s3 + $0x258] sm:$0xff] }
 0x1dc   :  { %v2922_v37 = vpop.f32.mrf.mxu1  ;;  %2994 = vmatpush.bf16.msrb.mxu1 %v4473_v24  ;;  %3017 = vmatpush.bf16.msrb.mxu3 %v4492_v23  ;;  %v4489_v24 = vld [vmem:[%s5952_s3 + $0x210] sm:$0xff] }
 0x1dd   :  { %v4471_v37 = vld [vmem:[%s5952_s3 + $0x180] sm:$0xff]  ;;  %v4501_v23 = vld [vmem:[%s5952_s3 + $0x270] sm:$0xff] }
 0x1de   :  { %v775_v1 = vpop.f32.mrf.mxu0  ;;  %3007 = vmatpush.bf16.msrb.mxu2 %v4481_v59  ;;  %v4510_v59 = vld [vmem:[%s5952_s3 + $0x2b8] sm:$0xff] }
 0x1df   :  { %v5372_v12 = vmax.f32 %v1048_v21, %v775_v1  ;;  %v4491_v21 = vld [vmem:[%s5952_s3 + $0x220] sm:$0xff] }
 0x1e0   :  { %2995 = vmatpush.bf16.msrb.mxu1 %v4472_v49  ;;  %3018 = vmatpush.bf16.msrb.mxu3 %v4491_v21  ;;  %v4488_v49 = vld [vmem:[%s5952_s3 + $0x208] sm:$0xff] }
 0x1e1   :  { %v4500_v21 = vld [vmem:[%s5952_s3 + $0x268] sm:$0xff] }
 0x1e4   :  { %2996 = vmatpush.bf16.msrb.mxu1 %v4471_v37  ;;  %3019 = vmatpush.bf16.msrb.mxu3 %v4490_v27  ;;  %v4487_v37 = vld [vmem:[%s5952_s3 + $0x200] sm:$0xff] }
 0x1e5   :  { %v4499_v27 = vld [vmem:[%s5952_s3 + $0x260] sm:$0xff] }
 0x1e6   :  { %v5392_v62 = vpop.f32.mrf.mxu0 }
 0x1e7   :  { %v1050_v34 = vmax.f32 %v5372_v12, %v5392_v62 }
 0x1e8   :  { %3028 = vmatpush.bf16.msra.mxu1 %v4502_v41  ;;  %3020 = vmatpush.bf16.msrb.mxu3 %v4489_v24  ;;  %v4480_v41 = vld [vmem:[%s5952_s3 + $0x1c8] sm:$0xff] }
 0x1e9   :  { %3008 = vmatpush.bf16.msrb.mxu2 %v4480_v41  ;;  %v4496_v41 = vld [vmem:[%s5952_s3 + $0x248] sm:$0xff] }
 0x1ea   :  { %v2933_v47 = vpop.f32.mrf.mxu2 }
 0x1eb   :  { %v2934_v1 = vadd.f32 %v2933_v47, %v2921_v40 }
 0x1ec   :  { %3029 = vmatpush.bf16.msra.mxu1 %v4501_v23  ;;  %3021 = vmatpush.bf16.msrb.mxu3 %v4488_v49 }
 0x1ee   :  { %v780_v46 = vpop.f32.mrf.mxu0 }
 0x1ef   :  { %v1019_v24 = vmax.f32 %v1018_v29, %v780_v46 }
 0x1f0   :  { %3030 = vmatpush.bf16.msra.mxu1 %v4500_v21  ;;  %3022 = vmatpush.bf16.msrb.mxu3 %v4487_v37  ;;  %v1187_v21 = vperm.slane %v5074_v9, 5 }
 0x1f2   :  { %v2935_v43 = vpop.f32.mrf.mxu2 }
 0x1f3   :  { %v4479_v43 = vld [vmem:[%s5952_s3 + $0x1c0] sm:$0xff] }
 0x1f4   :  { %3031 = vmatpush.bf16.msra.mxu1 %v4499_v27  ;;  %3009 = vmatpush.bf16.msrb.mxu2 %v4479_v43  ;;  %v4508_v43 = vld [vmem:[%s5952_s3 + $0x2a8] sm:$0xff] }
 0x1f6   :  { %v782_v40 = vpop.f32.mrf.mxu0 }
 0x1f7   :  { %v1054_v47 = vmax.f32 %v780_v46, %v782_v40  ;;  %v1020_v49 = vmax.f32 %v1019_v24, %v782_v40  ;;  %v4509_v46 = vld [vmem:[%s5952_s3 + $0x2b0] sm:$0xff]  ;;  %v4518_v24 = vld [vmem:[%s5952_s3 + $0x2f8] sm:$0xff] }
 0x1f8   :  { %3032 = vmatpush.bf16.msra.mxu1 %v4498_v53  ;;  %3041 = vmatpush.bf16.msra.mxu2 %v4510_v59  ;;  %v4517_v59 = vld [vmem:[%s5952_s3 + $0x2f0] sm:$0xff] }
 0x1fa   :  { %v2946_v7 = vpop.f32.mrf.mxu3 }
 0x1fb   :  { %v2947_v23 = vadd.f32 %v2946_v7, %v2934_v1 }
 0x1fc   :  { %3033 = vmatpush.bf16.msra.mxu1 %v4497_v8  ;;  %3042 = vmatpush.bf16.msra.mxu2 %v4509_v46 }
 0x1fe   :  { %v5457_v37 = vpop.f32.mrf.mxu0 }
 0x1ff   :  { %v1021_v33 = vmax.f32 %v1020_v49, %v5457_v37  ;;  %v5464_v29 = vmax.f32 %v1054_v47, %v5457_v37 }
 0x200   :  { %3034 = vmatpush.bf16.msra.mxu1 %v4496_v41  ;;  %3043 = vmatpush.bf16.msra.mxu2 %v4508_v43  ;;  %v4526_v43 = vld [vmem:[%s5952_s3 + $0x338] sm:$0xff] }
 0x201   :  { %v1237_v1 = vadd.f32 %v1187_v21, %v1021_v33  ;;  %v4495_v21 = vld [vmem:[%s5952_s3 + $0x240] sm:$0xff]  ;;  %v1027_v33 = vmax.f32 %v1026_v30, %v5457_v37  ;;  %v4505_v30 = vld [vmem:[%s5952_s3 + $0x290] sm:$0xff] }
 0x202   :  { %v2948_v40 = vpop.f32.mrf.mxu3 }
 0x203   :  { %v1262_v27 = vmax.f32 %v1237_v1, 0.0  ;;  %v4516_v1 = vld [vmem:[%s5952_s3 + $0x2e8] sm:$0xff]  ;;  %v1188_v40 = vperm.slane %v5074_v9, 6 }
 0x204   :  { %v2959_v7 = vpop.f32.mrf.mxu1  ;;  %3035 = vmatpush.bf16.msra.mxu1 %v4495_v21 }
 0x205   :  { %v1287_v47 = vpack.c.bf16 %v1262_v27, %v1262_v27  ;;  %v2960_v53 = vadd.f32 %v2959_v7, %v2947_v23  ;;  %v4507_v23 = vld [vmem:[%s5952_s3 + $0x2a0] sm:$0xff]  ;;  %v4506_v27 = vld [vmem:[%s5952_s3 + $0x298] sm:$0xff] }
 0x206   :  { %v787_v49 = vpop.f32.mrf.mxu0  ;;  %3044 = vmatpush.bf16.msra.mxu2 %v4507_v23 }
 0x207   :  { %2984 = vmatmul.bf16.vlgmr.msra.gmra.mxu3 %v1287_v47  ;;  %v1028_v46 = vmax.f32 %v1027_v33, %v787_v49  ;;  %v4514_v47 = vld [vmem:[%s5952_s3 + $0x2d8] sm:$0xff]  ;;  %v4513_v33 = vld [vmem:[%s5952_s3 + $0x2d0] sm:$0xff] }
 0x208   :  { %3054 = vmatpush.bf16.msra.mxu3 %v4518_v24 }
 0x20a   :  { %3045 = vmatpush.bf16.msra.mxu2 %v4506_v27 }
 0x20c   :  { %v2961_v8 = vpop.f32.mrf.mxu1  ;;  %3055 = vmatpush.bf16.msra.mxu3 %v4517_v59  ;;  %v4504_v59 = vld [vmem:[%s5952_s3 + $0x288] sm:$0xff] }
 0x20d   :  { %v4525_v8 = vld [vmem:[%s5952_s3 + $0x330] sm:$0xff] }
 0x20e   :  { %v5498_v41 = vpop.f32.mrf.mxu0  ;;  %3046 = vmatpush.bf16.msra.mxu2 %v4505_v30  ;;  %v1189_v30 = vperm.slane %v5074_v9, 7 }
 0x20f   :  { %v1029_v7 = vmax.f32 %v1028_v46, %v5498_v41 }
 0x210   :  { %3056 = vmatpush.bf16.msra.mxu3 %v4516_v1  ;;  %v4503_v1 = vld [vmem:[%s5952_s3 + $0x280] sm:$0xff] }
 0x211   :  { %v1238_v56 = vadd.f32 %v1188_v40, %v1029_v7  ;;  %v1035_v40 = vmax.f32 %v1034_v32, %v5498_v41  ;;  %v4512_v7 = vld [vmem:[%s5952_s3 + $0x2c8] sm:$0xff] }
 0x212   :  { %3047 = vmatpush.bf16.msra.mxu2 %v4504_v59  ;;  %v4534_v59 = vld [vmem:[%s5952_s3 + $0x378] sm:$0xff] }
 0x213   :  { %v1263_v24 = vmax.f32 %v1238_v56, 0.0 }
 0x214   :  { %3057 = vmatpush.bf16.msra.mxu3 %v4515_v3  ;;  %v4524_v3 = vld [vmem:[%s5952_s3 + $0x328] sm:$0xff] }
 0x215   :  { %v1288_v21 = vpack.c.bf16 %v1263_v24, %v1263_v24  ;;  %v1062_v24 = vmax.f32 %v5457_v37, %v787_v49  ;;  %v4522_v49 = vld [vmem:[%s5952_s3 + $0x318] sm:$0xff] }
 0x216   :  { %v792_v23 = vpop.f32.mrf.mxu0  ;;  %3048 = vmatpush.bf16.msra.mxu2 %v4503_v1 }
 0x217   :  { %2997 = vmatmul.bf16.vlgmr.msrb.gmra.mxu1 %v1288_v21  ;;  %v1036_v56 = vmax.f32 %v1035_v40, %v792_v23  ;;  %v1063_v32 = vmax.f32 %v1062_v24, %v5498_v41  ;;  %v4533_v40 = vld [vmem:[%s5952_s3 + $0x370] sm:$0xff]  ;;  %v1070_v24 = vmax.f32 %v5498_v41, %v792_v23  ;;  %v4542_v41 = vld [vmem:[%s5952_s3 + $0x3b8] sm:$0xff] }
 0x218   :  { %3058 = vmatpush.bf16.msra.mxu3 %v4514_v47  ;;  %3067 = vmatpush.bf16.msrb.mxu1 %v4526_v43  ;;  %v4523_v47 = vld [vmem:[%s5952_s3 + $0x320] sm:$0xff]  ;;  %v4530_v23 = vld [vmem:[%s5952_s3 + $0x358] sm:$0xff] }
 0x219   :  { %v1064_v37 = vmax.f32 %v1063_v32, %v4971_v54 }
 0x21a   :  { %v2972_v46 = vpop.f32.mrf.mxu2 }
 0x21b   :  { %v5529_v27 = vadd.f32 %v2972_v46, %v2960_v53  ;;  %v4511_v53 = vld [vmem:[%s5952_s3 + $0x2c0] sm:$0xff]  ;;  %v1065_v1 = vmax.f32 %v1064_v37, %v4997_v5  ;;  %v4521_v46 = vld [vmem:[%s5952_s3 + $0x310] sm:$0xff]  ;;  %v5573_v5 = vld [vmem:[%s5951_s2 + $0x8] sm:$0xff] }
 0x21c   :  { %3059 = vmatpush.bf16.msra.mxu3 %v4513_v33  ;;  %3068 = vmatpush.bf16.msrb.mxu1 %v4525_v8  ;;  %v1190_v26 = vperm.slane %v5573_v5, 0  ;;  %v1191_v12 = vperm.slane %v5573_v5, 1 }
 0x21e   :  { %v5539_v35 = vpop.f32.mrf.mxu0 }
 0x21f   :  { %v1037_v45 = vmax.f32 %v1036_v56, %v5539_v35  ;;  %v4520_v56 = vld [vmem:[%s5952_s3 + $0x308] sm:$0xff] }
 0x220   :  { %3060 = vmatpush.bf16.msra.mxu3 %v4512_v7  ;;  %3069 = vmatpush.bf16.msrb.mxu1 %v4524_v3  ;;  %v1043_v7 = vmax.f32 %v1042_v6, %v5539_v35  ;;  %v1066_v3 = vmax.f32 %v1065_v1, %v5021_v25  ;;  %v4541_v1 = vld [vmem:[%s5952_s3 + $0x3b0] sm:$0xff] }
 0x221   :  { %v1239_v43 = vadd.f32 %v1189_v30, %v1037_v45  ;;  %v4532_v30 = vld [vmem:[%s5952_s3 + $0x368] sm:$0xff] }
 0x222   :  { %v2974_v9 = vpop.f32.mrf.mxu2  ;;  %v1067_v32 = vmax.f32 %v1066_v3, %v5199_v44 }
 0x223   :  { %v1264_v21 = vmax.f32 %v1239_v43, 0.0  ;;  %v1071_v43 = vmax.f32 %v1070_v24, %v5539_v35 }
 0x224   :  { %3061 = vmatpush.bf16.msra.mxu3 %v4511_v53  ;;  %3070 = vmatpush.bf16.msrb.mxu1 %v4523_v47  ;;  %v4519_v53 = vld [vmem:[%s5952_s3 + $0x300] sm:$0xff]  ;;  %v1068_v37 = vmax.f32 %v1067_v32, %v5214_v14 }
 0x225   :  { %v1289_v33 = vpack.c.bf16 %v1264_v21, %v1264_v21  ;;  %v4531_v47 = vld [vmem:[%s5952_s3 + $0x360] sm:$0xff] }
 0x226   :  { %v5556_v8 = vpop.f32.mrf.mxu0 }
 0x227   :  { %3010 = vmatmul.bf16.vlgmr.msrb.gmra.mxu2 %v1289_v33  ;;  %v1044_v13 = vmax.f32 %v1043_v7, %v5556_v8  ;;  %v4529_v7 = vld [vmem:[%s5952_s3 + $0x350] sm:$0xff] }
 0x228   :  { %3071 = vmatpush.bf16.msrb.mxu1 %v4522_v49  ;;  %3080 = vmatpush.bf16.msrb.mxu2 %v4534_v59  ;;  %v1072_v49 = vmax.f32 %v1071_v43, %v5021_v25  ;;  %v4527_v43 = vld [vmem:[%s5952_s3 + $0x340] sm:$0xff] }
 0x22a   :  { %v1073_v3 = vmax.f32 %v1072_v49, %v5042_v42 }
 0x22c   :  { %3072 = vmatpush.bf16.msrb.mxu1 %v4521_v46  ;;  %3081 = vmatpush.bf16.msrb.mxu2 %v4533_v40  ;;  %v1069_v46 = vmax.f32 %v1068_v37, %v5234_v16  ;;  %v1193_v40 = vperm.slane %v5573_v5, 3  ;;  %v1074_v42 = vmax.f32 %v1073_v3, %v5061_v60 }
 0x22e   :  { %v800_v6 = vpop.f32.mrf.mxu0 }
 0x22f   :  { %v1045_v45 = vmax.f32 %v1044_v13, %v800_v6  ;;  %v1051_v25 = vmax.f32 %v1050_v34, %v800_v6  ;;  %v1243_v13 = vadd.f32 %v1193_v40, %v1069_v46  ;;  %v4538_v46 = vld [vmem:[%s5952_s3 + $0x398] sm:$0xff] }
 0x230   :  { %3073 = vmatpush.bf16.msrb.mxu1 %v4520_v56  ;;  %3082 = vmatpush.bf16.msrb.mxu2 %v4532_v30  ;;  %v1094_v56 = vmax.f32 %v5170_v52, %v5184_v57  ;;  %v4540_v30 = vld [vmem:[%s5952_s3 + $0x3a8] sm:$0xff]  ;;  %v4550_v40 = vld [vmem:[%s5952_s3 + $0x3f8] sm:$0xff] }
 0x231   :  { %v1240_v9 = vadd.f32 %v1190_v26, %v1045_v45  ;;  %v4528_v26 = vld [vmem:[%s5952_s3 + $0x348] sm:$0xff] }
 0x233   :  { %v1265_v21 = vmax.f32 %v1240_v9, 0.0  ;;  %v1075_v9 = vmax.f32 %v1074_v42, %v5234_v16 }
 0x234   :  { %3074 = vmatpush.bf16.msrb.mxu1 %v4519_v53  ;;  %3083 = vmatpush.bf16.msrb.mxu2 %v4531_v47  ;;  %v1095_v53 = vmax.f32 %v1094_v56, %v5199_v44  ;;  %v4539_v47 = vld [vmem:[%s5952_s3 + $0x3a0] sm:$0xff] }
 0x235   :  { %v1290_v59 = vpack.c.bf16 %v1265_v21, %v1265_v21 }
 0x236   :  { %v802_v33 = vpop.f32.mrf.mxu0 }
 0x237   :  { %3023 = vmatmul.bf16.vlgmr.msrb.gmra.mxu3 %v1290_v59  ;;  %v1052_v24 = vmax.f32 %v1051_v25, %v802_v33  ;;  %v1086_v45 = vmax.f32 %v800_v6, %v802_v33  ;;  %v1096_v33 = vmax.f32 %v1095_v53, %v4891_v22 }
 0x238   :  { %3093 = vmatpush.bf16.msrb.mxu3 %v4542_v41  ;;  %3084 = vmatpush.bf16.msrb.mxu2 %v4530_v23  ;;  %v1268_v41 = vmax.f32 %v1243_v13, 0.0  ;;  %v1078_v23 = vmax.f32 %v5539_v35, %v5556_v8  ;;  %v5972_v13 = vld [vmem:[#allocation3_spill] sm:$0xff] }
 0x239   :  { %v1097_v25 = vmax.f32 %v1096_v33, %v4904_v28 }
 0x23c   :  { %3094 = vmatpush.bf16.msrb.mxu3 %v4541_v1  ;;  %3085 = vmatpush.bf16.msrb.mxu2 %v4529_v7  ;;  %v1079_v1 = vmax.f32 %v1078_v23, %v800_v6  ;;  %v1076_v7 = vmax.f32 %v1075_v9, %v5243_v0  ;;  %v4537_v0 = vld [vmem:[%s5952_s3 + $0x390] sm:$0xff]  ;;  %v1102_v9 = vmax.f32 %v5199_v44, %v5214_v14  ;;  %v4566_v14 = vld [vmem:[%s5952_s3 + $0x478] sm:$0xff] }
 0x23e   :  { %v805_v62 = vpop.f32.mrf.mxu0  ;;  %v1080_v56 = vmax.f32 %v1079_v1, %v5061_v60  ;;  %v1077_v28 = vmax.f32 %v1076_v7, %v4821_v58  ;;  %v1196_v60 = vperm.slane %v5573_v5, 6  ;;  %v1103_v33 = vmax.f32 %v1102_v9, %v5234_v16  ;;  %v5979_v9 = vld [vmem:[#allocation9_spill] sm:$0xff] }
 0x23f   :  { %v1053_v34 = vmax.f32 %v1052_v24, %v805_v62  ;;  %v1087_v32 = vmax.f32 %v1086_v45, %v805_v62  ;;  %v5973_v45 = vld [vmem:[#allocation5_spill] sm:$0xff]  ;;  %v4536_v62 = vld [vmem:[%s5952_s3 + $0x388] sm:$0xff] }
 0x240   :  { %3095 = vmatpush.bf16.msrb.mxu3 %v4540_v30  ;;  %3086 = vmatpush.bf16.msrb.mxu2 %v4528_v26  ;;  %v1194_v30 = vperm.slane %v5573_v5, 4 }
 0x241   :  { %v1088_v21 = vmax.f32 %v1087_v32, %v5112_v11  ;;  %v1241_v37 = vadd.f32 %v1191_v12, %v1053_v34  ;;  %v1081_v12 = vmax.f32 %v1080_v56, %v5973_v45  ;;  %v5974_v34 = vld [vmem:[#allocation2_spill] sm:$0xff]  ;;  %v5977_v56 = vld [vmem:[#allocation8_spill] sm:$0xff] }
 0x242   :  { %v1098_v32 = vmax.f32 %v1097_v25, %v5974_v34  ;;  %v4564_v25 = vld [vmem:[%s5952_s3 + $0x468] sm:$0xff] }
 0x243   :  { %v1089_v49 = vmax.f32 %v1088_v21, %v5137_v20  ;;  %v1266_v59 = vmax.f32 %v1241_v37, 0.0  ;;  %v1293_v20 = vpack.c.bf16 %v1268_v41, %v1268_v41  ;;  %v1082_v21 = vmax.f32 %v1081_v12, %v5112_v11  ;;  %v4535_v37 = vld [vmem:[%s5952_s3 + $0x380] sm:$0xff] }
 0x244   :  { %3096 = vmatpush.bf16.msrb.mxu3 %v4539_v47  ;;  %3087 = vmatpush.bf16.msrb.mxu2 %v4527_v43  ;;  %v1244_v47 = vadd.f32 %v1194_v30, %v1077_v28  ;;  %v1192_v43 = vperm.slane %v5573_v5, 2  ;;  %v5975_v41 = vld [vmem:[#allocation6_spill] sm:$0xff]  ;;  %v5978_v30 = vld [vmem:[#allocation4_spill] sm:$0xff]  ;;  %v1195_v28 = vperm.slane %v5573_v5, 5 }
 0x245   :  { %v1090_v35 = vmax.f32 %v1089_v49, %v5153_v39  ;;  %v1291_v8 = vpack.c.bf16 %v1266_v59, %v1266_v59  ;;  %v4549_v39 = vld [vmem:[%s5952_s3 + $0x3f0] sm:$0xff]  ;;  %v1099_v23 = vmax.f32 %v1098_v32, %v5975_v41  ;;  %v1083_v1 = vmax.f32 %v1082_v21, %v4821_v58  ;;  %v4558_v58 = vld [vmem:[%s5952_s3 + $0x438] sm:$0xff]  ;;  %v4572_v41 = vld [vmem:[%s5952_s3 + $0x4a8] sm:$0xff] }
 0x246   :  { %v807_v3 = vpop.f32.mrf.mxu0  ;;  %v1269_v49 = vmax.f32 %v1244_v47, 0.0  ;;  %v4561_v47 = vld [vmem:[%s5952_s3 + $0x450] sm:$0xff] }
 0x247   :  { %v1091_v22 = vmax.f32 %v1090_v35, %v4844_v4  ;;  %v1056_v6 = vmax.f32 %v5464_v29, %v807_v3  ;;  %3036 = vmatmul.bf16.vlgmr.msra.gmra.mxu1 %v1291_v8  ;;  %3062 = vmatmul.bf16.vlgmr.msra.gmra.mxu3 %v1293_v20  ;;  %v4565_v8 = vld [vmem:[%s5952_s3 + $0x470] sm:$0xff]  ;;  %v1104_v3 = vmax.f32 %v1103_v33, %v5974_v34 }
 0x248   :  { %3097 = vmatpush.bf16.msrb.mxu3 %v4538_v46  ;;  %3106 = vmatpush.bf16.msra.mxu1 %v4550_v40  ;;  %v4546_v46 = vld [vmem:[%s5952_s3 + $0x3d8] sm:$0xff]  ;;  %v5976_v40 = vld [vmem:[#allocation7_spill] sm:$0xff] }
 0x249   :  { %v1092_v29 = vmax.f32 %v1091_v22, %v4861_v10  ;;  %v1057_v26 = vmax.f32 %v1056_v6, %v5972_v13  ;;  %v4548_v10 = vld [vmem:[%s5952_s3 + $0x3e8] sm:$0xff]  ;;  %v1100_v7 = vmax.f32 %v1099_v23, %v5976_v40  ;;  %v1084_v22 = vmax.f32 %v1083_v1, %v4833_v63  ;;  %v4545_v6 = vld [vmem:[%s5952_s3 + $0x3d0] sm:$0xff] }
 0x24a   :  { %v4557_v63 = vld [vmem:[%s5952_s3 + $0x430] sm:$0xff]  ;;  %v4544_v13 = vld [vmem:[%s5952_s3 + $0x3c8] sm:$0xff] }
 0x24b   :  { %v1093_v42 = vmax.f32 %v1092_v29, %v4872_v15  ;;  %v1058_v24 = vmax.f32 %v1057_v26, %v4971_v54  ;;  %v1105_v29 = vmax.f32 %v1104_v3, %v5978_v30  ;;  %v1085_v26 = vmax.f32 %v1084_v22, %v4844_v4  ;;  %v4543_v4 = vld [vmem:[%s5952_s3 + $0x3c0] sm:$0xff]  ;;  %v4581_v22 = vld [vmem:[%s5952_s3 + $0x4f0] sm:$0xff]  ;;  %v4598_v30 = vld [vmem:[%s5952_s3 + $0x578] sm:$0xff] }
 0x24c   :  { %3098 = vmatpush.bf16.msrb.mxu3 %v4537_v0  ;;  %3107 = vmatpush.bf16.msra.mxu1 %v4549_v39  ;;  %v1101_v0 = vmax.f32 %v1100_v7, %v5977_v56  ;;  %v1197_v39 = vperm.slane %v5573_v5, 7  ;;  %v4562_v5 = vld [vmem:[%s5952_s3 + $0x458] sm:$0xff]  ;;  %v4589_v7 = vld [vmem:[%s5952_s3 + $0x530] sm:$0xff] }
 0x24d   :  { %v1059_v53 = vmax.f32 %v1058_v24, %v5170_v52  ;;  %v1246_v15 = vadd.f32 %v1196_v60, %v1093_v42  ;;  %v4547_v52 = vld [vmem:[%s5952_s3 + $0x3e0] sm:$0xff]  ;;  %v4556_v24 = vld [vmem:[%s5952_s3 + $0x428] sm:$0xff]  ;;  %v1106_v45 = vmax.f32 %v1105_v29, %v4973_v55  ;;  %v1245_v12 = vadd.f32 %v1195_v28, %v1085_v26  ;;  %v4585_v26 = vld [vmem:[%s5952_s3 + $0x510] sm:$0xff] }
 0x24e   :  { %v4563_v60 = vld [vmem:[%s5952_s3 + $0x460] sm:$0xff]  ;;  %v1247_v42 = vadd.f32 %v1197_v39, %v1101_v0  ;;  %v4580_v0 = vld [vmem:[%s5952_s3 + $0x4e8] sm:$0xff]  ;;  %v4597_v28 = vld [vmem:[%s5952_s3 + $0x570] sm:$0xff] }
 0x24f   :  { %v1060_v54 = vmax.f32 %v1059_v53, %v5184_v57  ;;  %v1271_v11 = vmax.f32 %v1246_v15, 0.0  ;;  %v4555_v55 = vld [vmem:[%s5952_s3 + $0x420] sm:$0xff]  ;;  %v1107_v34 = vmax.f32 %v1106_v45, %v5977_v56  ;;  %v1270_v32 = vmax.f32 %v1245_v12, 0.0  ;;  %v4573_v15 = vld [vmem:[%s5952_s3 + $0x4b0] sm:$0xff]  ;;  %v4584_v45 = vld [vmem:[%s5952_s3 + $0x508] sm:$0xff] }
 0x250   :  { %3099 = vmatpush.bf16.msrb.mxu3 %v4536_v62  ;;  %3108 = vmatpush.bf16.msra.mxu1 %v4548_v10  ;;  %v4574_v62 = vld [vmem:[%s5952_s3 + $0x4b8] sm:$0xff]  ;;  %v1272_v10 = vmax.f32 %v1247_v42, 0.0  ;;  %v4587_v56 = vld [vmem:[%s5952_s3 + $0x520] sm:$0xff] }
 0x251   :  { %v1061_v57 = vmax.f32 %v1060_v54, %v5199_v44  ;;  %v1294_v44 = vpack.c.bf16 %v1269_v49, %v1269_v49  ;;  %v1296_v35 = vpack.c.bf16 %v1271_v11, %v1271_v11  ;;  %v1199_v54 = vperm.slane %v5254_v17, 1  ;;  %v4559_v11 = vld [vmem:[%s5952_s3 + $0x440] sm:$0xff]  ;;  %v4578_v42 = vld [vmem:[%s5952_s3 + $0x4d8] sm:$0xff] }
 0x252   :  { %v1297_v53 = vpack.c.bf16 %v1272_v10, %v1272_v10  ;;  %v1108_v21 = vmax.f32 %v1107_v34, %v5979_v9  ;;  %v1198_v49 = vperm.slane %v5254_v17, 0  ;;  %v4567_v39 = vld [vmem:[%s5952_s3 + $0x480] sm:$0xff] }
 0x253   :  { %v1242_v59 = vadd.f32 %v1192_v43, %v1061_v57  ;;  %v4554_v43 = vld [vmem:[%s5952_s3 + $0x418] sm:$0xff]  ;;  %v1249_v23 = vadd.f32 %v1199_v54, %v5286_v38  ;;  %v4553_v57 = vld [vmem:[%s5952_s3 + $0x410] sm:$0xff]  ;;  %v4579_v29 = vld [vmem:[%s5952_s3 + $0x4e0] sm:$0xff] }
 0x254   :  { %3100 = vmatpush.bf16.msrb.mxu3 %v4535_v37  ;;  %3109 = vmatpush.bf16.msra.mxu1 %v4547_v52  ;;  %v1295_v37 = vpack.c.bf16 %v1270_v32, %v1270_v32  ;;  %v4560_v52 = vld [vmem:[%s5952_s3 + $0x448] sm:$0xff]  ;;  %v4590_v38 = vld [vmem:[%s5952_s3 + $0x538] sm:$0xff]  ;;  %v5980_v12 = vld [vmem:[#allocation10_spill] sm:$0xff] }
 0x255   :  { %v1267_v20 = vmax.f32 %v1242_v59, 0.0  ;;  %v4571_v59 = vld [vmem:[%s5952_s3 + $0x4a0] sm:$0xff]  ;;  %v1274_v33 = vmax.f32 %v1249_v23, 0.0 }
 0x256   :  { %v4595_v34 = vld [vmem:[%s5952_s3 + $0x560] sm:$0xff] }
 0x257   :  { %3075 = vmatmul.bf16.vlgmr.msrb.gmra.mxu1 %v1294_v44  ;;  %3101 = vmatmul.bf16.vlgmr.msrb.gmra.mxu3 %v1296_v35  ;;  %v1292_v16 = vpack.c.bf16 %v1267_v20, %v1267_v20  ;;  %v1299_v40 = vpack.c.bf16 %v1274_v33, %v1274_v33  ;;  %v4551_v44 = vld [vmem:[%s5952_s3 + $0x400] sm:$0xff]  ;;  %v4582_v35 = vld [vmem:[%s5952_s3 + $0x4f8] sm:$0xff]  ;;  %v4569_v20 = vld [vmem:[%s5952_s3 + $0x490] sm:$0xff] }
 0x258   :  { %3132 = vmatpush.bf16.msra.mxu3 %v4566_v14  ;;  %3110 = vmatpush.bf16.msra.mxu1 %v4546_v46  ;;  %v1109_v14 = vmax.f32 %v1108_v21, %v5203_v48  ;;  %v4552_v48 = vld [vmem:[%s5952_s3 + $0x408] sm:$0xff]  ;;  %v4570_v46 = vld [vmem:[%s5952_s3 + $0x498] sm:$0xff] }
 0x259   :  { %3049 = vmatmul.bf16.vlgmr.msra.gmra.mxu2 %v1292_v16  ;;  %v4588_v16 = vld [vmem:[%s5952_s3 + $0x528] sm:$0xff]  ;;  %v4606_v21 = vld [vmem:[%s5952_s3 + $0x5b8] sm:$0xff] }
 0x25a   :  { %3119 = vmatpush.bf16.msra.mxu2 %v4558_v58  ;;  %v1248_v1 = vadd.f32 %v1198_v49, %v1109_v14  ;;  %v1200_v58 = vperm.slane %v5254_v17, 2 }
 0x25c   :  { %3133 = vmatpush.bf16.msra.mxu3 %v4565_v8  ;;  %3111 = vmatpush.bf16.msra.mxu1 %v4545_v6  ;;  %v1273_v8 = vmax.f32 %v1248_v1, 0.0  ;;  %v4568_v6 = vld [vmem:[%s5952_s3 + $0x488] sm:$0xff] }
 0x25d   :  { %v4604_v1 = vld [vmem:[%s5952_s3 + $0x5a8] sm:$0xff] }
 0x25e   :  { %3120 = vmatpush.bf16.msra.mxu2 %v4557_v63  ;;  %v1298_v3 = vpack.c.bf16 %v1273_v8, %v1273_v8 }
 0x260   :  { %3134 = vmatpush.bf16.msra.mxu3 %v4564_v25  ;;  %3112 = vmatpush.bf16.msra.mxu1 %v4544_v13  ;;  %v1250_v25 = vadd.f32 %v1200_v58, %v5269_v31  ;;  %v4586_v31 = vld [vmem:[%s5952_s3 + $0x518] sm:$0xff]  ;;  %v4621_v58 = vld [vmem:[%s5952_s3 + $0x630] sm:$0xff] }
 0x262   :  { %3121 = vmatpush.bf16.msra.mxu2 %v4556_v24  ;;  %v1275_v63 = vmax.f32 %v1250_v25, 0.0  ;;  %v1132_v24 = vmax.f32 %v5284_v18, %v5282_v36  ;;  %v1201_v36 = vperm.slane %v5254_v17, 3 }
 0x264   :  { %3135 = vmatpush.bf16.msra.mxu3 %v4563_v60  ;;  %3113 = vmatpush.bf16.msra.mxu1 %v4543_v4  ;;  %v1300_v13 = vpack.c.bf16 %v1275_v63, %v1275_v63  ;;  %v1202_v60 = vperm.slane %v5254_v17, 4  ;;  %v4596_v4 = vld [vmem:[%s5952_s3 + $0x568] sm:$0xff]  ;;  %v1133_v10 = vmax.f32 %v1132_v24, %v4885_v19  ;;  %v4614_v19 = vld [vmem:[%s5952_s3 + $0x5f8] sm:$0xff] }
 0x265   :  { %v4576_v17 = vld [vmem:[%s5952_s3 + $0x4c8] sm:$0xff] }
 0x266   :  { %3122 = vmatpush.bf16.msra.mxu2 %v4555_v55  ;;  %v4583_v55 = vld [vmem:[%s5952_s3 + $0x500] sm:$0xff] }
 0x267   :  { %3114 = vmatmul.bf16.vlgmr.msra.gmra.mxu1 %v1297_v53 }
 0x268   :  { %3136 = vmatpush.bf16.msra.mxu3 %v4562_v5  ;;  %3145 = vmatpush.bf16.msrb.mxu1 %v4574_v62  ;;  %v1252_v5 = vadd.f32 %v1202_v60, %v5980_v12  ;;  %v4577_v62 = vld [vmem:[%s5952_s3 + $0x4d0] sm:$0xff]  ;;  %v4615_v12 = vld [vmem:[%s5952_s3 + $0x600] sm:$0xff] }
 0x269   :  { %3088 = vmatmul.bf16.vlgmr.msrb.gmra.mxu2 %v1295_v37  ;;  %v4617_v60 = vld [vmem:[%s5952_s3 + $0x610] sm:$0xff] }
 0x26a   :  { %3123 = vmatpush.bf16.msra.mxu2 %v4554_v43  ;;  %v1277_v32 = vmax.f32 %v1252_v5, 0.0  ;;  %v4575_v43 = vld [vmem:[%s5952_s3 + $0x4c0] sm:$0xff] }
 0x26c   :  { %3137 = vmatpush.bf16.msra.mxu3 %v4561_v47  ;;  %3146 = vmatpush.bf16.msrb.mxu1 %v4573_v15  ;;  %v1251_v47 = vadd.f32 %v1201_v36, %v1133_v10  ;;  %v4594_v15 = vld [vmem:[%s5952_s3 + $0x558] sm:$0xff]  ;;  %v1302_v54 = vpack.c.bf16 %v1277_v32, %v1277_v32 }
 0x26e   :  { %3124 = vmatpush.bf16.msra.mxu2 %v4553_v57  ;;  %v1276_v9 = vmax.f32 %v1251_v47, 0.0  ;;  %v4612_v57 = vld [vmem:[%s5952_s3 + $0x5e8] sm:$0xff] }
 0x270   :  { %3138 = vmatpush.bf16.msra.mxu3 %v4560_v52  ;;  %3147 = vmatpush.bf16.msrb.mxu1 %v4572_v41  ;;  %v4593_v52 = vld [vmem:[%s5952_s3 + $0x550] sm:$0xff]  ;;  %v1301_v49 = vpack.c.bf16 %v1276_v9, %v1276_v9 }
 0x271   :  { %v4637_v41 = vld [vmem:[%s5951_s2 + $0x10] sm:$0xff] }
 0x272   :  { %3125 = vmatpush.bf16.msra.mxu2 %v4552_v48  ;;  %v1203_v23 = vperm.slane %v4637_v41, 5  ;;  %v4611_v48 = vld [vmem:[%s5952_s3 + $0x5e0] sm:$0xff] }
 0x274   :  { %3139 = vmatpush.bf16.msra.mxu3 %v4559_v11  ;;  %3148 = vmatpush.bf16.msrb.mxu1 %v4571_v59  ;;  %v4605_v59 = vld [vmem:[%s5952_s3 + $0x5b0] sm:$0xff]  ;;  %v1253_v33 = vadd.f32 %v1203_v23, %v5232_v2  ;;  %v4610_v2 = vld [vmem:[%s5952_s3 + $0x5d8] sm:$0xff] }
 0x276   :  { %3126 = vmatpush.bf16.msra.mxu2 %v4551_v44 }
 0x277   :  { %3140 = vmatmul.bf16.vlgmr.msra.gmra.mxu3 %v1299_v40  ;;  %v1278_v40 = vmax.f32 %v1253_v33, 0.0 }
 0x278   :  { %3171 = vmatpush.bf16.msrb.mxu3 %v4590_v38  ;;  %3149 = vmatpush.bf16.msrb.mxu1 %v4570_v46  ;;  %v4592_v38 = vld [vmem:[%s5952_s3 + $0x548] sm:$0xff]  ;;  %v4591_v46 = vld [vmem:[%s5952_s3 + $0x540] sm:$0xff] }
 0x279   :  { %3127 = vmatmul.bf16.vlgmr.msra.gmra.mxu2 %v1298_v3  ;;  %v1303_v8 = vpack.c.bf16 %v1278_v40, %v1278_v40  ;;  %v4602_v3 = vld [vmem:[%s5952_s3 + $0x598] sm:$0xff] }
 0x27a   :  { %3158 = vmatpush.bf16.msrb.mxu2 %v4582_v35  ;;  %v4603_v35 = vld [vmem:[%s5952_s3 + $0x5a0] sm:$0xff] }
 0x27c   :  { %3172 = vmatpush.bf16.msrb.mxu3 %v4589_v7  ;;  %3150 = vmatpush.bf16.msrb.mxu1 %v4569_v20  ;;  %v4622_v7 = vld [vmem:[%s5952_s3 + $0x638] sm:$0xff]  ;;  %v4609_v20 = vld [vmem:[%s5952_s3 + $0x5d0] sm:$0xff] }
 0x27e   :  { %3159 = vmatpush.bf16.msrb.mxu2 %v4581_v22  ;;  %v4608_v22 = vld [vmem:[%s5952_s3 + $0x5c8] sm:$0xff] }
 0x280   :  { %3173 = vmatpush.bf16.msrb.mxu3 %v4588_v16  ;;  %3151 = vmatpush.bf16.msrb.mxu1 %v4568_v6  ;;  %v1205_v16 = vperm.slane %v4637_v41, 7  ;;  %v4620_v6 = vld [vmem:[%s5952_s3 + $0x628] sm:$0xff] }
 0x282   :  { %3160 = vmatpush.bf16.msrb.mxu2 %v4580_v0  ;;  %v1255_v25 = vadd.f32 %v1205_v16, %v5297_v51  ;;  %v4607_v0 = vld [vmem:[%s5952_s3 + $0x5c0] sm:$0xff]  ;;  %v4600_v51 = vld [vmem:[%s5952_s3 + $0x588] sm:$0xff] }
 0x284   :  { %3174 = vmatpush.bf16.msrb.mxu3 %v4587_v56  ;;  %3152 = vmatpush.bf16.msrb.mxu1 %v4567_v39  ;;  %v4601_v56 = vld [vmem:[%s5952_s3 + $0x590] sm:$0xff]  ;;  %v4619_v39 = vld [vmem:[%s5952_s3 + $0x620] sm:$0xff]  ;;  %v1280_v63 = vmax.f32 %v1255_v25, 0.0 }
 0x286   :  { %3161 = vmatpush.bf16.msrb.mxu2 %v4579_v29  ;;  %v4618_v29 = vld [vmem:[%s5952_s3 + $0x618] sm:$0xff] }
 0x287   :  { %3153 = vmatmul.bf16.vlgmr.msrb.gmra.mxu1 %v1300_v13  ;;  %v1305_v13 = vpack.c.bf16 %v1280_v63, %v1280_v63 }
 0x288   :  { %3175 = vmatpush.bf16.msrb.mxu3 %v4586_v31  ;;  %3184 = vmatpush.bf16.msra.mxu1 %v4598_v30 }
 0x28a   :  { %3162 = vmatpush.bf16.msrb.mxu2 %v4578_v42  ;;  %v2985_v18 = vpop.f32.mrf.mxu3  ;;  %v4636_v42 = vld [vmem:[%s5951_s2 + $0x18] ss:$0 sm:$0xff] }
 0x28b   :  { %v2986_v53 = vadd.f32 %v2985_v18, %v5529_v27  ;;  %v4613_v27 = vld [vmem:[%s5952_s3 + $0x5f0] sm:$0xff] }
 0x28c   :  { %3176 = vmatpush.bf16.msrb.mxu3 %v4585_v26  ;;  %3185 = vmatpush.bf16.msra.mxu1 %v4597_v28  ;;  %v4599_v26 = vld [vmem:[%s5952_s3 + $0x580] sm:$0xff]  ;;  %v1279_v28 = vmax.f32 %v5267_v61, 0.0  ;;  %v1256_v61 = vadd.f32 %v4636_v42, %v5308_v50 }
 0x28e   :  { %3163 = vmatpush.bf16.msrb.mxu2 %v4577_v62  ;;  %v1304_v24 = vpack.c.bf16 %v1279_v28, %v1279_v28  ;;  %v1281_v5 = vmax.f32 %v1256_v61, 0.0 }
 0x290   :  { %3177 = vmatpush.bf16.msrb.mxu3 %v4584_v45  ;;  %3186 = vmatpush.bf16.msra.mxu1 %v4596_v4  ;;  %v4616_v4 = vld [vmem:[%s5952_s3 + $0x608] sm:$0xff]  ;;  %v1306_v36 = vpack.c.bf16 %v1281_v5, %v1281_v5 }
 0x292   :  { %3164 = vmatpush.bf16.msrb.mxu2 %v4576_v17  ;;  %v2987_v37 = vpop.f32.mrf.mxu3 }
 0x294   :  { %3178 = vmatpush.bf16.msrb.mxu3 %v4583_v55  ;;  %3187 = vmatpush.bf16.msra.mxu1 %v4595_v34  ;;  %v2998_v14 = vpop.f32.mrf.mxu1 }
 0x295   :  { %v2999_v11 = vadd.f32 %v2998_v14, %v2986_v53 }
 0x296   :  { %3165 = vmatpush.bf16.msrb.mxu2 %v4575_v43 }
 0x297   :  { %3179 = vmatmul.bf16.vlgmr.msrb.gmra.mxu3 %v1302_v54 }
 0x298   :  { %3210 = vmatpush.bf16.msra.mxu3 %v4614_v19  ;;  %3188 = vmatpush.bf16.msra.mxu1 %v4594_v15 }
 0x299   :  { %3166 = vmatmul.bf16.vlgmr.msrb.gmra.mxu2 %v1301_v49 }
 0x29a   :  { %3197 = vmatpush.bf16.msra.mxu2 %v4606_v21 }
 0x29c   :  { %3211 = vmatpush.bf16.msra.mxu3 %v4613_v27  ;;  %3189 = vmatpush.bf16.msra.mxu1 %v4593_v52  ;;  %v3000_v44 = vpop.f32.mrf.mxu1 }
 0x29e   :  { %3198 = vmatpush.bf16.msra.mxu2 %v4605_v59 }
 0x2a0   :  { %3212 = vmatpush.bf16.msra.mxu3 %v4612_v57  ;;  %3190 = vmatpush.bf16.msra.mxu1 %v4592_v38 }
 0x2a2   :  { %3199 = vmatpush.bf16.msra.mxu2 %v4604_v1 }
 0x2a4   :  { %3213 = vmatpush.bf16.msra.mxu3 %v4611_v48  ;;  %3191 = vmatpush.bf16.msra.mxu1 %v4591_v46 }
 0x2a6   :  { %3200 = vmatpush.bf16.msra.mxu2 %v4603_v35 }
 0x2a7   :  { %3192 = vmatmul.bf16.vlgmr.msra.gmra.mxu1 %v1303_v8 }
 0x2a8   :  { %3214 = vmatpush.bf16.msra.mxu3 %v4610_v2  ;;  %3223 = vmatpush.bf16.msrb.mxu1 %v4622_v7 }
 0x2aa   :  { %3201 = vmatpush.bf16.msra.mxu2 %v4602_v3  ;;  %v3011_v31 = vpop.f32.mrf.mxu2 }
 0x2ab   :  { %v3012_v30 = vadd.f32 %v3011_v31, %v2999_v11 }
 0x2ac   :  { %3215 = vmatpush.bf16.msra.mxu3 %v4609_v20  ;;  %3224 = vmatpush.bf16.msrb.mxu1 %v4621_v58 }
 0x2ae   :  { %3202 = vmatpush.bf16.msra.mxu2 %v4601_v56 }
 0x2b0   :  { %3216 = vmatpush.bf16.msra.mxu3 %v4608_v22  ;;  %3225 = vmatpush.bf16.msrb.mxu1 %v4620_v6 }
 0x2b2   :  { %3203 = vmatpush.bf16.msra.mxu2 %v4600_v51  ;;  %v3013_v45 = vpop.f32.mrf.mxu2 }
 0x2b4   :  { %3217 = vmatpush.bf16.msra.mxu3 %v4607_v0  ;;  %3226 = vmatpush.bf16.msrb.mxu1 %v4619_v39 }
 0x2b6   :  { %3204 = vmatpush.bf16.msra.mxu2 %v4599_v26 }
 0x2b7   :  { %3218 = vmatmul.bf16.vlgmr.msra.gmra.mxu3 %v1305_v13 }
 0x2b8   :  { %3227 = vmatpush.bf16.msrb.mxu1 %v4618_v29 }
 0x2b9   :  { %3205 = vmatmul.bf16.vlgmr.msra.gmra.mxu2 %v1304_v24 }
 0x2ba   :  { %v3024_v62 = vpop.f32.mrf.mxu3 }
 0x2bb   :  { %v3025_v10 = vadd.f32 %v3024_v62, %v3012_v30 }
 0x2bc   :  { %3228 = vmatpush.bf16.msrb.mxu1 %v4617_v60 }
 0x2c0   :  { %3229 = vmatpush.bf16.msrb.mxu1 %v4616_v4 }
 0x2c2   :  { %v3026_v18 = vpop.f32.mrf.mxu3 }
 0x2c4   :  { %3230 = vmatpush.bf16.msrb.mxu1 %v4615_v12  ;;  %v3037_v55 = vpop.f32.mrf.mxu1 }
 0x2c5   :  { %v3038_v34 = vadd.f32 %v3037_v55, %v3025_v10 }
 0x2c7   :  { %3231 = vmatmul.bf16.vlgmr.msrb.gmra.mxu1 %v1306_v36 }
 0x2ca   :  { %v3063_v32 = vpop.f32.mrf.mxu3 }
 0x2cc   :  { %v3039_v53 = vpop.f32.mrf.mxu1 }
 0x2d2   :  { %v3065_v19 = vpop.f32.mrf.mxu3 }
 0x2d4   :  { %v3076_v17 = vpop.f32.mrf.mxu1 }
 0x2da   :  { %v3102_v50 = vpop.f32.mrf.mxu3 }
 0x2dc   :  { %v3050_v47 = vpop.f32.mrf.mxu2  ;;  %v3078_v15 = vpop.f32.mrf.mxu1 }
 0x2dd   :  { %v3051_v54 = vadd.f32 %v3050_v47, %v3038_v34 }
 0x2df   :  { %v3064_v27 = vadd.f32 %v3063_v32, %v3051_v54 }
 0x2e1   :  { %v3077_v43 = vadd.f32 %v3076_v17, %v3064_v27 }
 0x2e2   :  { %v3104_v9 = vpop.f32.mrf.mxu3 }
 0x2e4   :  { %v3052_v21 = vpop.f32.mrf.mxu2  ;;  %v3115_v37 = vpop.f32.mrf.mxu1 }
 0x2ec   :  { %v3117_v52 = vpop.f32.mrf.mxu1  ;;  %v3089_v41 = vpop.f32.mrf.mxu2 }
 0x2ed   :  { %v3090_v23 = vadd.f32 %v3089_v41, %v3077_v43 }
 0x2ef   :  { %v3103_v57 = vadd.f32 %v3102_v50, %v3090_v23 }
 0x2f1   :  { %v3116_v14 = vadd.f32 %v3115_v37, %v3103_v57 }
 0x2f4   :  { %v3091_v49 = vpop.f32.mrf.mxu2 }
 0x2fa   :  { %v3141_v11 = vpop.f32.mrf.mxu3 }
 0x2fc   :  { %v3128_v59 = vpop.f32.mrf.mxu2 }
 0x2fd   :  { %v3129_v35 = vadd.f32 %v3128_v59, %v3116_v14 }
 0x2ff   :  { %v3142_v20 = vadd.f32 %v3141_v11, %v3129_v35 }
 0x302   :  { %v3143_v38 = vpop.f32.mrf.mxu3 }
 0x304   :  { %v3154_v33 = vpop.f32.mrf.mxu1  ;;  %v3130_v48 = vpop.f32.mrf.mxu2 }
 0x305   :  { %v3155_v58 = vadd.f32 %v3154_v33, %v3142_v20 }
 0x30c   :  { %v3156_v1 = vpop.f32.mrf.mxu1 }
 0x31a   :  { %v3180_v46 = vpop.f32.mrf.mxu3 }
 0x31c   :  { %v3167_v40 = vpop.f32.mrf.mxu2 }
 0x31d   :  { %v3168_v16 = vadd.f32 %v3167_v40, %v3155_v58 }
 0x31f   :  { %v3181_v22 = vadd.f32 %v3180_v46, %v3168_v16 }
 0x322   :  { %v3182_v2 = vpop.f32.mrf.mxu3 }
 0x324   :  { %v3193_v7 = vpop.f32.mrf.mxu1  ;;  %v3169_v44 = vpop.f32.mrf.mxu2 }
 0x325   :  { %v3194_v6 = vadd.f32 %v3193_v7, %v3181_v22 }
 0x32c   :  { %v3195_v8 = vpop.f32.mrf.mxu1 }
 0x33a   :  { %v3219_v3 = vpop.f32.mrf.mxu3 }
 0x33c   :  { %v3206_v25 = vpop.f32.mrf.mxu2 }
 0x33d   :  { %v3207_v56 = vadd.f32 %v3206_v25, %v3194_v6 }
 0x33f   :  { %v3220_v39 = vadd.f32 %v3219_v3, %v3207_v56 }
 0x342   :  { %v3221_v0 = vpop.f32.mrf.mxu3 }
 0x344   :  { %v3232_v63 = vpop.f32.mrf.mxu1  ;;  %v3208_v30 = vpop.f32.mrf.mxu2 }
 0x345   :  { %v3233_v51 = vadd.f32 %v3232_v63, %v3220_v39 }
 0x347   :  { %v3236_v31 = vmax.f32 %v3233_v51, 0.0 }
 0x349   :  { %3237 = vst [vmem:[%s5954_s5] sm:$0xff] %v3236_v31 }
 0x34c   :  { %v3234_v29 = vpop.f32.mrf.mxu1 }

</bundles_post_ra>
